<compile_context>
chip_gen: v7x
topology: tpu7x:2x2x1
jax: 0.10.0
libtpu: 0.0.40
codegen_flags: <defaults>
</compile_context>

<pallas_src>
import math

import jax
import jax.numpy as jnp
from jax.experimental import pallas as pl
from jax.experimental.pallas import tpu as pltpu

# ----------------------------- config (scaled-down) -----------------------------
B = 2          # batch
CIN = 3        # accelerometer channels
K = 5          # conv kernel == stride
STRIDE = 5
D = 32         # d_model            (192 in the original)
HEAD = 8       # head_size          (32 in the original)
NHEAD = D // HEAD
DEPTH = 2      # encoder layers     (12 in the original)
FFN = 4 * D    # dim_feedforward
L_IN = 200     # input length       (9000 in the original)
L1 = (L_IN - K) // STRIDE + 1    # 40   (1800 in the original)
L2 = (L1 - K) // STRIDE + 1      # 8    (360 in the original)
PATCH = CIN * K                  # 15
LN_EPS = 1e-5
ATT_SCALE = 1.0 / math.sqrt(HEAD)   # folded into wq/bq at pack time


# ----------------------------- in-kernel math helpers ---------------------------
def _mm_t(a, w):
    """a @ w.T  (PyTorch nn.Linear convention), f32 accumulation on the MXU."""
    return jax.lax.dot_general(a, w, (((1,), (1,)), ((), ())),
                               preferred_element_type=jnp.float32)


def _bmm(a, b, ca, cb):
    """Batched matmul over leading (head) axis: contract a[ca] with b[cb]."""
    return jax.lax.dot_general(a, b, (((ca,), (cb,)), ((0,), (0,))),
                               preferred_element_type=jnp.float32)


def _gelu(x):
    # TODO(synk): nn.GELU() default is the exact erf form; erf has no reliable
    # Mosaic lowering, so the tanh approximation is used (max abs err ~1e-3).
    c = math.sqrt(2.0 / math.pi)
    return 0.5 * x * (1.0 + jnp.tanh(c * (x + 0.044715 * x * x * x)))


def _layernorm(x, g, b, eps=LN_EPS):
    mu = jnp.mean(x, axis=-1, keepdims=True)
    var = jnp.mean((x - mu) ** 2, axis=-1, keepdims=True)
    return (x - mu) * jax.lax.rsqrt(var + eps) * g + b


# ----------------------------- fused Pallas kernel -------------------------------
def fused_kernel(p_ref, embw_ref, posb_ref,
                 wqkv_ref, bqkv_ref, wo_ref, vec_ref, b1_ref, w1_ref, w2_ref,
                 hwcd_ref, hp_ref, hc_ref,
                 o_ref, x_sc):
    """grid = (batch, layer); activation (L1, D) resident in x_sc across layers."""
    l = pl.program_id(1)

    # --- layer 0: patch-embed Conv1d(3, D, 5, 5) as matmul + (pos + bias) ---
    @pl.when(l == 0)
    def _():
        p = p_ref[0].astype(jnp.float32)                       # (L1, PATCH)
        x_sc[...] = _mm_t(p, embw_ref[...]) + posb_ref[...]    # (L1, D)

    x = x_sc[...]

    wqkv = wqkv_ref[0]      # (3D, D)  packed [wq*scale | wk | wv] rows
    bqkv = bqkv_ref[0]      # (1, 3D)  packed [bq*scale | bk | bv]
    wo = wo_ref[0]          # (D, D)   out-proj (torch out,in layout)
    vec = vec_ref[0]        # (6, D): ln1_g, ln1_b, bo, ln2_g, ln2_b, b2
    b1 = b1_ref[0]          # (1, FFN)
    w1 = w1_ref[0]          # (FFN, D)
    w2 = w2_ref[0]          # (D, FFN)

    ln1_g, ln1_b = vec[0:1], vec[1:2]
    bo = vec[2:3]
    ln2_g, ln2_b = vec[3:4], vec[4:5]
    b2 = vec[5:6]

    # --- self attention block: x = x + out_proj(MHA(LN1(x))) ---
    h = _layernorm(x, ln1_g, ln1_b)                            # (L1, D)

    # ONE lane-dense QKV matmul; scale already folded into the q rows/bias.
    qkv = _mm_t(h, wqkv) + bqkv                                # (L1, 3D)

    # Trace-time lane slices -> (3*NHEAD, L1, HEAD); no per-head matmuls.
    qkv3 = jnp.stack([qkv[:, i * HEAD:(i + 1) * HEAD]
                      for i in range(3 * NHEAD)], axis=0)
    q3 = qkv3[0:NHEAD]                                         # (NHEAD, L1, HEAD)
    k3 = qkv3[NHEAD:2 * NHEAD]
    v3 = qkv3[2 * NHEAD:3 * NHEAD]

    s = _bmm(q3, k3, 2, 2)                                     # (NHEAD, L1, L1)
    s = s - jnp.max(s, axis=-1, keepdims=True)
    e = jnp.exp(s)
    # Exact reciprocal of the (NHEAD, L1, 1) row-sums (correctness review).
    inv = 1.0 / jnp.sum(e, axis=-1, keepdims=True)
    a = e * inv
    o3 = _bmm(a, v3, 2, 1)                                     # (NHEAD, L1, HEAD)

    # Fused out-projection: re-concat heads to (L1, D), one contraction-D matmul.
    o = jnp.concatenate([o3[i] for i in range(NHEAD)], axis=-1)   # (L1, D)
    x = x + _mm_t(o, wo) + bo

    # --- feed-forward block: x = x + W2 GELU(W1 LN2(x)) ---
    h2 = _layernorm(x, ln2_g, ln2_b)
    f = _gelu(_mm_t(h2, w1) + b1)                              # (L1, FFN)
    x = x + _mm_t(f, w2) + b2
    x_sc[...] = x

    # --- last layer: Conv1d(D, 1, 5, 5) + flatten + Linear(L2, 3), folded ---
    @pl.when(l == DEPTH - 1)
    def _():
        r = jnp.sum(x * hwcd_ref[...], axis=-1, keepdims=True)     # (L1, 1)
        out = jnp.sum(r * hp_ref[...], axis=0, keepdims=True) + hc_ref[...]
        o_ref[0] = out.astype(o_ref.dtype)                         # (1, 3)


# ----------------------------- glue (reshapes / specs) ---------------------------
def conv_patches_ncl(x):
    """(B, CIN, L) -> (B, L//K, CIN*K); flat index = c*K + k (torch weight order)."""
    b, c, l = x.shape
    lo = (l - K) // STRIDE + 1
    x = x[:, :, :lo * K].reshape(b, c, lo, K)
    return jnp.transpose(x, (0, 2, 1, 3)).reshape(b, lo, c * K)


def sinusoidal_pos(length, dim, m=10000.0):
    half = dim // 2
    freq = jnp.exp(jnp.arange(half, dtype=jnp.float32) * (-math.log(m) / half))
    ang = jnp.arange(length, dtype=jnp.float32)[:, None] * freq[None, :]
    return jnp.concatenate([jnp.sin(ang), jnp.cos(ang)], axis=-1)   # (length, dim)


def _pack_fused(params, pos):
    """Wrapper-side (free) repacking of weights for the fused kernel."""
    def stack(fn):
        return jnp.stack([fn(lp) for lp in params["layers"]], axis=0)

    # Packed QKV: (3D, D) torch-Linear layout, attention scale folded into q.
    wqkv = stack(lambda lp: jnp.concatenate(
        [lp["wq"] * ATT_SCALE, lp["wk"], lp["wv"]], axis=0))        # (DEPTH, 3D, D)
    bqkv = stack(lambda lp: jnp.concatenate(
        [lp["bq"] * ATT_SCALE, lp["bk"], lp["bv"]], axis=-1))       # (DEPTH, 1, 3D)
    wo = stack(lambda lp: lp["wo"])                                 # (DEPTH, D, D)
    vec = stack(lambda lp: jnp.concatenate(
        [lp["ln1_g"], lp["ln1_b"], lp["bo"], lp["ln2_g"], lp["ln2_b"], lp["b2"]],
        axis=0))                                                    # (DEPTH, 6, D)
    b1 = stack(lambda lp: lp["b1"])                                 # (DEPTH, 1, FFN)
    w1 = stack(lambda lp: lp["w1"])                                 # (DEPTH, FFN, D)
    w2 = stack(lambda lp: lp["w2"])                                 # (DEPTH, D, FFN)

    pos_bias = pos + params["emb_b"]                                # (L1, D)

    # Folded head:  out[j] = sum_{i,d} x[i,d] * wcd[i,d] * P[i,j] + const[j]
    #   with i = 5*t + k,  wcd[i,d] = conv2_w[k*D+d],  P[i,j] = proj_w[j, t]
    wc = params["conv2_w"].reshape(K, D)
    hwcd = jnp.tile(wc, (L2, 1))                                    # (L1, D)
    hp = jnp.repeat(params["proj_w"].T, K, axis=0)                  # (L1, 3)
    hc = (params["conv2_b"][0, 0] * jnp.sum(params["proj_w"], axis=1)[None, :]
          + params["proj_b"])                                       # (1, 3)

    return (params["emb_w"], pos_bias, wqkv, bqkv, wo, vec, b1, w1, w2,
            hwcd, hp, hc)


def accelerometer_forward(x0, params, pos):
    p = conv_patches_ncl(x0)                                        # (B, L1, PATCH)
    (emb_w, pos_bias, wqkv, bqkv, wo, vec, b1, w1, w2,
     hwcd, hp, hc) = _pack_fused(params, pos)

    def const_spec(shape):
        return pl.BlockSpec(shape, lambda b, l, _n=len(shape): (0,) * _n)

    def layer_spec(shape):
        return pl.BlockSpec((1,) + shape,
                            lambda b, l, _n=len(shape): (l,) + (0,) * _n)

    out = pl.pallas_call(
        fused_kernel,
        out_shape=jax.ShapeDtypeStruct((B, 1, 3), jnp.float32),
        grid=(B, DEPTH),
        in_specs=[
            pl.BlockSpec((1, L1, PATCH), lambda b, l: (b, 0, 0)),   # patches
            const_spec((D, PATCH)),                                 # emb_w
            const_spec((L1, D)),                                    # pos + emb_b
            layer_spec((3 * D, D)),                                 # wqkv (packed)
            layer_spec((1, 3 * D)),                                 # bqkv (lane-dense)
            layer_spec((D, D)),                                     # wo
            layer_spec((6, D)),                                     # packed vectors
            layer_spec((1, FFN)),                                   # b1
            layer_spec((FFN, D)),                                   # w1
            layer_spec((D, FFN)),                                   # w2
            const_spec((L1, D)),                                    # head wcd
            const_spec((L1, 3)),                                    # head P
            const_spec((1, 3)),                                     # head const
        ],
        out_specs=pl.BlockSpec((1, 1, 3), lambda b, l: (b, 0, 0)),
        scratch_shapes=[pltpu.VMEM((L1, D), jnp.float32)],
        # NOTE: depth must remain the innermost, sequential ("arbitrary") axis:
        # x_sc residency and the l==0 / l==DEPTH-1 gates rely on it.
        compiler_params=pltpu.CompilerParams(
            dimension_semantics=("parallel", "arbitrary")),
    )(p, emb_w, pos_bias, wqkv, bqkv, wo, vec, b1, w1, w2, hwcd, hp, hc)
    return out.reshape(B, 3)


# ----------------------------- deterministic params ------------------------------
def init_params(key):
    keys = iter(jax.random.split(key, 4 + 14 * DEPTH + 8))

    def nrm(shape, scale=0.02):
        return scale * jax.random.normal(next(keys), shape, dtype=jnp.float32)

    params = {
        "emb_w": nrm((D, CIN * K), 0.1),     # torch Conv1d weight (D, 3, 5), flat c*K+k
        "emb_b": nrm((1, D)),
        "conv2_w": nrm((1, K * D), 0.1),     # torch Conv1d(D,1,5) weight, flat k*D+d
        "conv2_b": nrm((1, 1)),
        "proj_w": nrm((3, L2), 0.1),         # torch Linear(L2, 3) weight
        "proj_b": nrm((1, 3)),
        "layers": [],
    }
    for _ in range(DEPTH):
        params["layers"].append({
            "ln1_g": jnp.ones((1, D), jnp.float32),
            "ln1_b": jnp.zeros((1, D), jnp.float32),
            "wq": nrm((D, D)), "wk": nrm((D, D)), "wv": nrm((D, D)),
            "bq": nrm((1, D)), "bk": nrm((1, D)), "bv": nrm((1, D)),
            "wo": nrm((D, D)), "bo": nrm((1, D)),
            "ln2_g": jnp.ones((1, D), jnp.float32),
            "ln2_b": jnp.zeros((1, D), jnp.float32),
            "w1": nrm((FFN, D)), "b1": nrm((1, FFN)),
            "w2": nrm((D, FFN)), "b2": nrm((1, D)),
        })
    return params


# ----------------------------- pure-JAX reference --------------------------------
def ref_forward(x0, params, pos):
    hp = jax.lax.Precision.HIGHEST

    def lin(x, w, b):
        return jnp.einsum("sd,ed->se", x, w, precision=hp) + b

    p = conv_patches_ncl(x0)
    rows = []
    for bb in range(B):
        x = jnp.einsum("lf,df->ld", p[bb], params["emb_w"], precision=hp) \
            + params["emb_b"] + pos
        for lp in params["layers"]:
            h = _layernorm(x, lp["ln1_g"], lp["ln1_b"])
            q = lin(h, lp["wq"], lp["bq"])
            k = lin(h, lp["wk"], lp["bk"])
            v = lin(h, lp["wv"], lp["bv"])
            outs = []
            for hh in range(NHEAD):
                sl = slice(hh * HEAD, (hh + 1) * HEAD)
                s = jnp.einsum("qd,kd->qk", q[:, sl], k[:, sl], precision=hp) / math.sqrt(HEAD)
                s = s - jnp.max(s, axis=-1, keepdims=True)
                e = jnp.exp(s)
                a = e / jnp.sum(e, axis=-1, keepdims=True)
                outs.append(jnp.einsum("qk,kd->qd", a, v[:, sl], precision=hp))
            attn = jnp.concatenate(outs, axis=-1)
            x = x + lin(attn, lp["wo"], lp["bo"])
            h2 = _layernorm(x, lp["ln2_g"], lp["ln2_b"])
            x = x + lin(_gelu(lin(h2, lp["w1"], lp["b1"])), lp["w2"], lp["b2"])
        rows.append(x)
    x = jnp.stack(rows)                                     # (B, L1, D)
    p2 = x.reshape(B, L2, K * D)
    y = jnp.sum(p2 * params["conv2_w"][None, :, :], axis=-1) + params["conv2_b"]
    return jnp.einsum("bt,jt->bj", y, params["proj_w"], precision=hp) + params["proj_b"]


# ----------------------------- main ----------------------------------------------
if __name__ == "__main__":
    key = jax.random.PRNGKey(0)
    kx, kp = jax.random.split(key)
    x0 = jax.random.normal(kx, (B, CIN, L_IN), dtype=jnp.float32)   # NCL like PyTorch
    params = init_params(kp)
    pos = sinusoidal_pos(L1, D)

    fwd = jax.jit(accelerometer_forward)
    out = jax.block_until_ready(fwd(x0, params, pos))

    assert out.shape == (B, 3), out.shape
    assert bool(jnp.all(jnp.isfinite(out))), "non-finite output"

    ref = ref_forward(x0, params, pos)
    max_diff = float(jnp.max(jnp.abs(out - ref)))
    assert max_diff < 5e-3, f"kernel vs reference mismatch: {max_diff}"

    print("KERNEL_OK")
</pallas_src>

<mosaic_0001>
module attributes {stable_mosaic.version = 11 : i64} {
  func.func @fused_kernel(%arg0: i32, %arg1: i32, %arg2: memref<1x40x15xf32, #tpu.memory_space<vmem>>, %arg3: memref<32x15xf32, #tpu.memory_space<vmem>>, %arg4: memref<40x32xf32, #tpu.memory_space<vmem>>, %arg5: memref<1x96x32xf32, #tpu.memory_space<vmem>>, %arg6: memref<1x1x96xf32, #tpu.memory_space<vmem>>, %arg7: memref<1x32x32xf32, #tpu.memory_space<vmem>>, %arg8: memref<1x6x32xf32, #tpu.memory_space<vmem>>, %arg9: memref<1x1x128xf32, #tpu.memory_space<vmem>>, %arg10: memref<1x128x32xf32, #tpu.memory_space<vmem>>, %arg11: memref<1x32x128xf32, #tpu.memory_space<vmem>>, %arg12: memref<40x32xf32, #tpu.memory_space<vmem>>, %arg13: memref<40x3xf32, #tpu.memory_space<vmem>>, %arg14: memref<1x3xf32, #tpu.memory_space<vmem>>, %arg15: memref<1x1x3xf32, #tpu.memory_space<vmem>>, %arg16: memref<40x32xf32, #tpu.memory_space<vmem>>) attributes {dimension_semantics = [#tpu.dimension_semantics<parallel>, #tpu.dimension_semantics<arbitrary>], iteration_bounds = array<i64: 2, 2>, scalar_prefetch = 0 : i64, scratch_operands = 1 : i64, tpu.core_type = #tpu.core_type<tc>, window_params = [{transform_indices = @transform_0, window_bounds = array<i64: 1, 40, 15>}, {pipeline_mode = #tpu.pipeline_mode<synchronous>, transform_indices = @transform_1, window_bounds = array<i64: 32, 15>}, {pipeline_mode = #tpu.pipeline_mode<synchronous>, transform_indices = @transform_2, window_bounds = array<i64: 40, 32>}, {transform_indices = @transform_3, window_bounds = array<i64: 1, 96, 32>}, {transform_indices = @transform_4, window_bounds = array<i64: 1, 1, 96>}, {transform_indices = @transform_5, window_bounds = array<i64: 1, 32, 32>}, {transform_indices = @transform_6, window_bounds = array<i64: 1, 6, 32>}, {transform_indices = @transform_7, window_bounds = array<i64: 1, 1, 128>}, {transform_indices = @transform_8, window_bounds = array<i64: 1, 128, 32>}, {transform_indices = @transform_9, window_bounds = array<i64: 1, 32, 128>}, {pipeline_mode = #tpu.pipeline_mode<synchronous>, transform_indices = @transform_10, window_bounds = array<i64: 40, 32>}, {pipeline_mode = #tpu.pipeline_mode<synchronous>, transform_indices = @transform_11, window_bounds = array<i64: 40, 3>}, {pipeline_mode = #tpu.pipeline_mode<synchronous>, transform_indices = @transform_12, window_bounds = array<i64: 1, 3>}, {transform_indices = @transform_13, window_bounds = array<i64: 1, 1, 3>}]} {
    %c0_i32 = arith.constant 0 : i32
    %0 = arith.cmpi eq, %arg1, %c0_i32 : i32
    %1 = arith.extui %0 : i1 to i32
    %c0_i32_0 = arith.constant 0 : i32
    %2 = arith.cmpi ne, %1, %c0_i32_0 : i32
    scf.if %2 {
      %c0_48 = arith.constant 0 : index
      %c0_49 = arith.constant 0 : index
      %c0_50 = arith.constant 0 : index
      %149 = vector.load %arg2[%c0_48, %c0_49, %c0_50] : memref<1x40x15xf32, #tpu.memory_space<vmem>>, vector<1x40x15xf32>
      %150 = vector.shape_cast %149 : vector<1x40x15xf32> to vector<40x15xf32>
      %c0_51 = arith.constant 0 : index
      %c0_52 = arith.constant 0 : index
      %151 = vector.load %arg3[%c0_51, %c0_52] : memref<32x15xf32, #tpu.memory_space<vmem>>, vector<32x15xf32>
      %cst_53 = arith.constant dense<0.000000e+00> : vector<40x32xf32>
      %152 = tpu.matmul %150, %151, %cst_53 {dimension_numbers = #tpu.dot_dimension_numbers<[1], [1], [0], [0], [0, 0, 1, 0], [], []>} : vector<40x15xf32>, vector<32x15xf32>, vector<40x32xf32> -> vector<40x32xf32>
      %c0_54 = arith.constant 0 : index
      %c0_55 = arith.constant 0 : index
      %153 = vector.load %arg4[%c0_54, %c0_55] : memref<40x32xf32, #tpu.memory_space<vmem>>, vector<40x32xf32>
      %154 = arith.addf %152, %153 : vector<40x32xf32>
      %c0_56 = arith.constant 0 : index
      %c0_57 = arith.constant 0 : index
      %155 = vector.load %arg16[%c0_56, %c0_57] : memref<40x32xf32, #tpu.memory_space<vmem>>, vector<40x32xf32>
      tpu.vector_store %arg16[%c0_56, %c0_57], %154 {strides = array<i32>} : memref<40x32xf32, #tpu.memory_space<vmem>>, vector<40x32xf32>,
    } else {
    }
    %c0 = arith.constant 0 : index
    %c0_1 = arith.constant 0 : index
    %3 = vector.load %arg16[%c0, %c0_1] : memref<40x32xf32, #tpu.memory_space<vmem>>, vector<40x32xf32>
    %c0_2 = arith.constant 0 : index
    %c0_3 = arith.constant 0 : index
    %c0_4 = arith.constant 0 : index
    %4 = vector.load %arg5[%c0_2, %c0_3, %c0_4] : memref<1x96x32xf32, #tpu.memory_space<vmem>>, vector<1x96x32xf32>
    %5 = vector.shape_cast %4 : vector<1x96x32xf32> to vector<96x32xf32>
    %c0_5 = arith.constant 0 : index
    %c0_6 = arith.constant 0 : index
    %c0_7 = arith.constant 0 : index
    %6 = vector.load %arg6[%c0_5, %c0_6, %c0_7] : memref<1x1x96xf32, #tpu.memory_space<vmem>>, vector<1x1x96xf32>
    %7 = vector.shape_cast %6 : vector<1x1x96xf32> to vector<1x96xf32>
    %c0_8 = arith.constant 0 : index
    %c0_9 = arith.constant 0 : index
    %c0_10 = arith.constant 0 : index
    %8 = vector.load %arg7[%c0_8, %c0_9, %c0_10] : memref<1x32x32xf32, #tpu.memory_space<vmem>>, vector<1x32x32xf32>
    %9 = vector.shape_cast %8 : vector<1x32x32xf32> to vector<32x32xf32>
    %c0_11 = arith.constant 0 : index
    %c0_12 = arith.constant 0 : index
    %c0_13 = arith.constant 0 : index
    %10 = vector.load %arg8[%c0_11, %c0_12, %c0_13] : memref<1x6x32xf32, #tpu.memory_space<vmem>>, vector<1x6x32xf32>
    %11 = vector.shape_cast %10 : vector<1x6x32xf32> to vector<6x32xf32>
    %c0_14 = arith.constant 0 : index
    %c0_15 = arith.constant 0 : index
    %c0_16 = arith.constant 0 : index
    %12 = vector.load %arg9[%c0_14, %c0_15, %c0_16] : memref<1x1x128xf32, #tpu.memory_space<vmem>>, vector<1x1x128xf32>
    %13 = vector.shape_cast %12 : vector<1x1x128xf32> to vector<1x128xf32>
    %c0_17 = arith.constant 0 : index
    %c0_18 = arith.constant 0 : index
    %c0_19 = arith.constant 0 : index
    %14 = vector.load %arg10[%c0_17, %c0_18, %c0_19] : memref<1x128x32xf32, #tpu.memory_space<vmem>>, vector<1x128x32xf32>
    %15 = vector.shape_cast %14 : vector<1x128x32xf32> to vector<128x32xf32>
    %c0_20 = arith.constant 0 : index
    %c0_21 = arith.constant 0 : index
    %c0_22 = arith.constant 0 : index
    %16 = vector.load %arg11[%c0_20, %c0_21, %c0_22] : memref<1x32x128xf32, #tpu.memory_space<vmem>>, vector<1x32x128xf32>
    %17 = vector.shape_cast %16 : vector<1x32x128xf32> to vector<32x128xf32>
    %18 = vector.extract_strided_slice %11 {offsets = [0, 0], sizes = [1, 32], strides = [1, 1]} : vector<6x32xf32> to vector<1x32xf32>
    %19 = vector.extract_strided_slice %11 {offsets = [1, 0], sizes = [1, 32], strides = [1, 1]} : vector<6x32xf32> to vector<1x32xf32>
    %20 = vector.extract_strided_slice %11 {offsets = [2, 0], sizes = [1, 32], strides = [1, 1]} : vector<6x32xf32> to vector<1x32xf32>
    %21 = vector.extract_strided_slice %11 {offsets = [3, 0], sizes = [1, 32], strides = [1, 1]} : vector<6x32xf32> to vector<1x32xf32>
    %22 = vector.extract_strided_slice %11 {offsets = [4, 0], sizes = [1, 32], strides = [1, 1]} : vector<6x32xf32> to vector<1x32xf32>
    %23 = vector.extract_strided_slice %11 {offsets = [5, 0], sizes = [1, 32], strides = [1, 1]} : vector<6x32xf32> to vector<1x32xf32>
    %cst = arith.constant dense<0.000000e+00> : vector<40xf32>
    %24 = vector.multi_reduction <add>, %3, %cst [1] : vector<40x32xf32> to vector<40xf32>
    %25 = vector.shape_cast %24 : vector<40xf32> to vector<40x1xf32>
    %cst_23 = arith.constant 3.200000e+01 : f32
    %26 = vector.broadcast %cst_23 : f32 to vector<40x1xf32>
    %27 = arith.divf %25, %26 : vector<40x1xf32>
    %28 = vector.broadcast %27 : vector<40x1xf32> to vector<40x32xf32>
    %29 = arith.subf %3, %28 : vector<40x32xf32>
    %30 = arith.mulf %29, %29 : vector<40x32xf32>
    %cst_24 = arith.constant dense<0.000000e+00> : vector<40xf32>
    %31 = vector.multi_reduction <add>, %30, %cst_24 [1] : vector<40x32xf32> to vector<40xf32>
    %32 = vector.shape_cast %31 : vector<40xf32> to vector<40x1xf32>
    %cst_25 = arith.constant 3.200000e+01 : f32
    %33 = vector.broadcast %cst_25 : f32 to vector<40x1xf32>
    %34 = arith.divf %32, %33 : vector<40x1xf32>
    %35 = vector.broadcast %27 : vector<40x1xf32> to vector<40x32xf32>
    %36 = arith.subf %3, %35 : vector<40x32xf32>
    %cst_26 = arith.constant 9.99999974E-6 : f32
    %37 = vector.broadcast %cst_26 : f32 to vector<40x1xf32>
    %38 = arith.addf %34, %37 : vector<40x1xf32>
    %39 = math.rsqrt %38 : vector<40x1xf32>
    %40 = vector.broadcast %39 : vector<40x1xf32> to vector<40x32xf32>
    %41 = arith.mulf %36, %40 : vector<40x32xf32>
    %42 = vector.broadcast %18 : vector<1x32xf32> to vector<40x32xf32>
    %43 = arith.mulf %41, %42 : vector<40x32xf32>
    %44 = vector.broadcast %19 : vector<1x32xf32> to vector<40x32xf32>
    %45 = arith.addf %43, %44 : vector<40x32xf32>
    %cst_27 = arith.constant dense<0.000000e+00> : vector<40x96xf32>
    %46 = tpu.matmul %45, %5, %cst_27 {dimension_numbers = #tpu.dot_dimension_numbers<[1], [1], [0], [0], [0, 0, 1, 0], [], []>} : vector<40x32xf32>, vector<96x32xf32>, vector<40x96xf32> -> vector<40x96xf32>
    %47 = vector.broadcast %7 : vector<1x96xf32> to vector<40x96xf32>
    %48 = arith.addf %46, %47 : vector<40x96xf32>
    %49 = vector.extract_strided_slice %48 {offsets = [0, 0], sizes = [40, 8], strides = [1, 1]} : vector<40x96xf32> to vector<40x8xf32>
    %50 = vector.extract_strided_slice %48 {offsets = [0, 8], sizes = [40, 8], strides = [1, 1]} : vector<40x96xf32> to vector<40x8xf32>
    %51 = vector.extract_strided_slice %48 {offsets = [0, 16], sizes = [40, 8], strides = [1, 1]} : vector<40x96xf32> to vector<40x8xf32>
    %52 = vector.extract_strided_slice %48 {offsets = [0, 24], sizes = [40, 8], strides = [1, 1]} : vector<40x96xf32> to vector<40x8xf32>
    %53 = vector.extract_strided_slice %48 {offsets = [0, 32], sizes = [40, 8], strides = [1, 1]} : vector<40x96xf32> to vector<40x8xf32>
    %54 = vector.extract_strided_slice %48 {offsets = [0, 40], sizes = [40, 8], strides = [1, 1]} : vector<40x96xf32> to vector<40x8xf32>
    %55 = vector.extract_strided_slice %48 {offsets = [0, 48], sizes = [40, 8], strides = [1, 1]} : vector<40x96xf32> to vector<40x8xf32>
    %56 = vector.extract_strided_slice %48 {offsets = [0, 56], sizes = [40, 8], strides = [1, 1]} : vector<40x96xf32> to vector<40x8xf32>
    %57 = vector.extract_strided_slice %48 {offsets = [0, 64], sizes = [40, 8], strides = [1, 1]} : vector<40x96xf32> to vector<40x8xf32>
    %58 = vector.extract_strided_slice %48 {offsets = [0, 72], sizes = [40, 8], strides = [1, 1]} : vector<40x96xf32> to vector<40x8xf32>
    %59 = vector.extract_strided_slice %48 {offsets = [0, 80], sizes = [40, 8], strides = [1, 1]} : vector<40x96xf32> to vector<40x8xf32>
    %60 = vector.extract_strided_slice %48 {offsets = [0, 88], sizes = [40, 8], strides = [1, 1]} : vector<40x96xf32> to vector<40x8xf32>
    %61 = vector.shape_cast %49 : vector<40x8xf32> to vector<1x40x8xf32>
    %62 = vector.shape_cast %50 : vector<40x8xf32> to vector<1x40x8xf32>
    %63 = vector.shape_cast %51 : vector<40x8xf32> to vector<1x40x8xf32>
    %64 = vector.shape_cast %52 : vector<40x8xf32> to vector<1x40x8xf32>
    %65 = vector.shape_cast %53 : vector<40x8xf32> to vector<1x40x8xf32>
    %66 = vector.shape_cast %54 : vector<40x8xf32> to vector<1x40x8xf32>
    %67 = vector.shape_cast %55 : vector<40x8xf32> to vector<1x40x8xf32>
    %68 = vector.shape_cast %56 : vector<40x8xf32> to vector<1x40x8xf32>
    %69 = vector.shape_cast %57 : vector<40x8xf32> to vector<1x40x8xf32>
    %70 = vector.shape_cast %58 : vector<40x8xf32> to vector<1x40x8xf32>
    %71 = vector.shape_cast %59 : vector<40x8xf32> to vector<1x40x8xf32>
    %72 = vector.shape_cast %60 : vector<40x8xf32> to vector<1x40x8xf32>
    %73 = tpu.concatenate %61, %62, %63, %64, %65, %66, %67, %68, %69, %70, %71, %72 in 0 : vector<1x40x8xf32>, vector<1x40x8xf32>, vector<1x40x8xf32>, vector<1x40x8xf32>, vector<1x40x8xf32>, vector<1x40x8xf32>, vector<1x40x8xf32>, vector<1x40x8xf32>, vector<1x40x8xf32>, vector<1x40x8xf32>, vector<1x40x8xf32>, vector<1x40x8xf32> -> vector<12x40x8xf32>
    %74 = vector.extract_strided_slice %73 {offsets = [0, 0, 0], sizes = [4, 40, 8], strides = [1, 1, 1]} : vector<12x40x8xf32> to vector<4x40x8xf32>
    %75 = vector.extract_strided_slice %73 {offsets = [4, 0, 0], sizes = [4, 40, 8], strides = [1, 1, 1]} : vector<12x40x8xf32> to vector<4x40x8xf32>
    %76 = vector.extract_strided_slice %73 {offsets = [8, 0, 0], sizes = [4, 40, 8], strides = [1, 1, 1]} : vector<12x40x8xf32> to vector<4x40x8xf32>
    %cst_28 = arith.constant dense<0.000000e+00> : vector<4x40x40xf32>
    %77 = tpu.matmul %74, %75, %cst_28 {dimension_numbers = #tpu.dot_dimension_numbers<[2], [2], [1], [1], [0, 0, 0, 1, 1, 1], [0], [0]>} : vector<4x40x8xf32>, vector<4x40x8xf32>, vector<4x40x40xf32> -> vector<4x40x40xf32>
    %cst_29 = arith.constant dense<0xFF800000> : vector<4x40xf32>
    %78 = vector.multi_reduction <maximumf>, %77, %cst_29 [2] : vector<4x40x40xf32> to vector<4x40xf32>
    %79 = vector.shape_cast %78 : vector<4x40xf32> to vector<4x40x1xf32>
    %80 = vector.broadcast %79 : vector<4x40x1xf32> to vector<4x40x40xf32>
    %81 = arith.subf %77, %80 : vector<4x40x40xf32>
    %82 = math.exp %81 : vector<4x40x40xf32>
    %cst_30 = arith.constant dense<0.000000e+00> : vector<4x40xf32>
    %83 = vector.multi_reduction <add>, %82, %cst_30 [2] : vector<4x40x40xf32> to vector<4x40xf32>
    %84 = vector.shape_cast %83 : vector<4x40xf32> to vector<4x40x1xf32>
    %cst_31 = arith.constant 1.000000e+00 : f32
    %85 = vector.broadcast %cst_31 : f32 to vector<4x40x1xf32>
    %86 = arith.divf %85, %84 : vector<4x40x1xf32>
    %87 = vector.broadcast %86 : vector<4x40x1xf32> to vector<4x40x40xf32>
    %88 = arith.mulf %82, %87 : vector<4x40x40xf32>
    %cst_32 = arith.constant dense<0.000000e+00> : vector<4x40x8xf32>
    %89 = tpu.matmul %88, %76, %cst_32 {dimension_numbers = #tpu.dot_dimension_numbers<[2], [1], [1], [2], [0, 0, 0, 1, 1, 2], [0], [0]>} : vector<4x40x40xf32>, vector<4x40x8xf32>, vector<4x40x8xf32> -> vector<4x40x8xf32>
    %90 = vector.extract_strided_slice %89 {offsets = [0, 0, 0], sizes = [1, 40, 8], strides = [1, 1, 1]} : vector<4x40x8xf32> to vector<1x40x8xf32>
    %91 = vector.shape_cast %90 : vector<1x40x8xf32> to vector<40x8xf32>
    %92 = vector.extract_strided_slice %89 {offsets = [1, 0, 0], sizes = [1, 40, 8], strides = [1, 1, 1]} : vector<4x40x8xf32> to vector<1x40x8xf32>
    %93 = vector.shape_cast %92 : vector<1x40x8xf32> to vector<40x8xf32>
    %94 = vector.extract_strided_slice %89 {offsets = [2, 0, 0], sizes = [1, 40, 8], strides = [1, 1, 1]} : vector<4x40x8xf32> to vector<1x40x8xf32>
    %95 = vector.shape_cast %94 : vector<1x40x8xf32> to vector<40x8xf32>
    %96 = vector.extract_strided_slice %89 {offsets = [3, 0, 0], sizes = [1, 40, 8], strides = [1, 1, 1]} : vector<4x40x8xf32> to vector<1x40x8xf32>
    %97 = vector.shape_cast %96 : vector<1x40x8xf32> to vector<40x8xf32>
    %98 = tpu.concatenate %91, %93, %95, %97 in 1 : vector<40x8xf32>, vector<40x8xf32>, vector<40x8xf32>, vector<40x8xf32> -> vector<40x32xf32>
    %cst_33 = arith.constant dense<0.000000e+00> : vector<40x32xf32>
    %99 = tpu.matmul %98, %9, %cst_33 {dimension_numbers = #tpu.dot_dimension_numbers<[1], [1], [0], [0], [0, 0, 1, 0], [], []>} : vector<40x32xf32>, vector<32x32xf32>, vector<40x32xf32> -> vector<40x32xf32>
    %100 = arith.addf %3, %99 : vector<40x32xf32>
    %101 = vector.broadcast %20 : vector<1x32xf32> to vector<40x32xf32>
    %102 = arith.addf %100, %101 : vector<40x32xf32>
    %cst_34 = arith.constant dense<0.000000e+00> : vector<40xf32>
    %103 = vector.multi_reduction <add>, %102, %cst_34 [1] : vector<40x32xf32> to vector<40xf32>
    %104 = vector.shape_cast %103 : vector<40xf32> to vector<40x1xf32>
    %cst_35 = arith.constant 3.200000e+01 : f32
    %105 = vector.broadcast %cst_35 : f32 to vector<40x1xf32>
    %106 = arith.divf %104, %105 : vector<40x1xf32>
    %107 = vector.broadcast %106 : vector<40x1xf32> to vector<40x32xf32>
    %108 = arith.subf %102, %107 : vector<40x32xf32>
    %109 = arith.mulf %108, %108 : vector<40x32xf32>
    %cst_36 = arith.constant dense<0.000000e+00> : vector<40xf32>
    %110 = vector.multi_reduction <add>, %109, %cst_36 [1] : vector<40x32xf32> to vector<40xf32>
    %111 = vector.shape_cast %110 : vector<40xf32> to vector<40x1xf32>
    %cst_37 = arith.constant 3.200000e+01 : f32
    %112 = vector.broadcast %cst_37 : f32 to vector<40x1xf32>
    %113 = arith.divf %111, %112 : vector<40x1xf32>
    %114 = vector.broadcast %106 : vector<40x1xf32> to vector<40x32xf32>
    %115 = arith.subf %102, %114 : vector<40x32xf32>
    %cst_38 = arith.constant 9.99999974E-6 : f32
    %116 = vector.broadcast %cst_38 : f32 to vector<40x1xf32>
    %117 = arith.addf %113, %116 : vector<40x1xf32>
    %118 = math.rsqrt %117 : vector<40x1xf32>
    %119 = vector.broadcast %118 : vector<40x1xf32> to vector<40x32xf32>
    %120 = arith.mulf %115, %119 : vector<40x32xf32>
    %121 = vector.broadcast %21 : vector<1x32xf32> to vector<40x32xf32>
    %122 = arith.mulf %120, %121 : vector<40x32xf32>
    %123 = vector.broadcast %22 : vector<1x32xf32> to vector<40x32xf32>
    %124 = arith.addf %122, %123 : vector<40x32xf32>
    %cst_39 = arith.constant dense<0.000000e+00> : vector<40x128xf32>
    %125 = tpu.matmul %124, %15, %cst_39 {dimension_numbers = #tpu.dot_dimension_numbers<[1], [1], [0], [0], [0, 0, 1, 0], [], []>} : vector<40x32xf32>, vector<128x32xf32>, vector<40x128xf32> -> vector<40x128xf32>
    %126 = vector.broadcast %13 : vector<1x128xf32> to vector<40x128xf32>
    %127 = arith.addf %125, %126 : vector<40x128xf32>
    %cst_40 = arith.constant 5.000000e-01 : f32
    %128 = vector.broadcast %cst_40 : f32 to vector<40x128xf32>
    %129 = arith.mulf %128, %127 : vector<40x128xf32>
    %cst_41 = arith.constant 4.471500e-02 : f32
    %130 = vector.broadcast %cst_41 : f32 to vector<40x128xf32>
    %131 = arith.mulf %130, %127 : vector<40x128xf32>
    %132 = arith.mulf %131, %127 : vector<40x128xf32>
    %133 = arith.mulf %132, %127 : vector<40x128xf32>
    %134 = arith.addf %127, %133 : vector<40x128xf32>
    %cst_42 = arith.constant 0.797884583 : f32
    %135 = vector.broadcast %cst_42 : f32 to vector<40x128xf32>
    %136 = arith.mulf %135, %134 : vector<40x128xf32>
    %137 = math.tanh %136 : vector<40x128xf32>
    %cst_43 = arith.constant 1.000000e+00 : f32
    %138 = vector.broadcast %cst_43 : f32 to vector<40x128xf32>
    %139 = arith.addf %138, %137 : vector<40x128xf32>
    %140 = arith.mulf %129, %139 : vector<40x128xf32>
    %cst_44 = arith.constant dense<0.000000e+00> : vector<40x32xf32>
    %141 = tpu.matmul %140, %17, %cst_44 {dimension_numbers = #tpu.dot_dimension_numbers<[1], [1], [0], [0], [0, 0, 1, 0], [], []>} : vector<40x128xf32>, vector<32x128xf32>, vector<40x32xf32> -> vector<40x32xf32>
    %142 = arith.addf %102, %141 : vector<40x32xf32>
    %143 = vector.broadcast %23 : vector<1x32xf32> to vector<40x32xf32>
    %144 = arith.addf %142, %143 : vector<40x32xf32>
    %c0_45 = arith.constant 0 : index
    %c0_46 = arith.constant 0 : index
    %145 = vector.load %arg16[%c0_45, %c0_46] : memref<40x32xf32, #tpu.memory_space<vmem>>, vector<40x32xf32>
    tpu.vector_store %arg16[%c0_45, %c0_46], %144 {strides = array<i32>} : memref<40x32xf32, #tpu.memory_space<vmem>>, vector<40x32xf32>,
    %c1_i32 = arith.constant 1 : i32
    %146 = arith.cmpi eq, %arg1, %c1_i32 : i32
    %147 = arith.extui %146 : i1 to i32
    %c0_i32_47 = arith.constant 0 : i32
    %148 = arith.cmpi ne, %147, %c0_i32_47 : i32
    scf.if %148 {
      %c0_48 = arith.constant 0 : index
      %c0_49 = arith.constant 0 : index
      %149 = vector.load %arg12[%c0_48, %c0_49] : memref<40x32xf32, #tpu.memory_space<vmem>>, vector<40x32xf32>
      %150 = arith.mulf %144, %149 : vector<40x32xf32>
      %cst_50 = arith.constant dense<0.000000e+00> : vector<40xf32>
      %151 = vector.multi_reduction <add>, %150, %cst_50 [1] : vector<40x32xf32> to vector<40xf32>
      %152 = vector.shape_cast %151 : vector<40xf32> to vector<40x1xf32>
      %c0_51 = arith.constant 0 : index
      %c0_52 = arith.constant 0 : index
      %153 = vector.load %arg13[%c0_51, %c0_52] : memref<40x3xf32, #tpu.memory_space<vmem>>, vector<40x3xf32>
      %154 = vector.broadcast %152 : vector<40x1xf32> to vector<40x3xf32>
      %155 = arith.mulf %154, %153 : vector<40x3xf32>
      %cst_53 = arith.constant dense<0.000000e+00> : vector<3xf32>
      %156 = vector.multi_reduction <add>, %155, %cst_53 [0] : vector<40x3xf32> to vector<3xf32>
      %157 = vector.shape_cast %156 : vector<3xf32> to vector<1x3xf32>
      %c0_54 = arith.constant 0 : index
      %c0_55 = arith.constant 0 : index
      %158 = vector.load %arg14[%c0_54, %c0_55] : memref<1x3xf32, #tpu.memory_space<vmem>>, vector<1x3xf32>
      %159 = arith.addf %157, %158 : vector<1x3xf32>
      %c0_56 = arith.constant 0 : index
      %c0_57 = arith.constant 0 : index
      %c0_58 = arith.constant 0 : index
      %160 = vector.load %arg15[%c0_56, %c0_57, %c0_58] : memref<1x1x3xf32, #tpu.memory_space<vmem>>, vector<1x1x3xf32>
      %161 = vector.shape_cast %160 : vector<1x1x3xf32> to vector<1x3xf32>
      %162 = vector.shape_cast %159 : vector<1x3xf32> to vector<1x1x3xf32>
      tpu.vector_store %arg15[%c0_56, %c0_57, %c0_58], %162 {strides = array<i32>} : memref<1x1x3xf32, #tpu.memory_space<vmem>>, vector<1x1x3xf32>,
    } else {
    }
    return
  }
  func.func @transform_0(%arg0: i32, %arg1: i32) -> (i32, i32, i32) {
    %c0_i32 = arith.constant 0 : i32
    %c0_i32_0 = arith.constant 0 : i32
    %c0_i32_1 = arith.constant 0 : i32
    return %arg0, %c0_i32, %c0_i32_0 : i32, i32, i32
  }
  func.func @transform_1(%arg0: i32, %arg1: i32) -> (i32, i32) {
    %c0_i32 = arith.constant 0 : i32
    %c0_i32_0 = arith.constant 0 : i32
    %c0_i32_1 = arith.constant 0 : i32
    return %c0_i32, %c0_i32_0 : i32, i32
  }
  func.func @transform_2(%arg0: i32, %arg1: i32) -> (i32, i32) {
    %c0_i32 = arith.constant 0 : i32
    %c0_i32_0 = arith.constant 0 : i32
    %c0_i32_1 = arith.constant 0 : i32
    return %c0_i32, %c0_i32_0 : i32, i32
  }
  func.func @transform_3(%arg0: i32, %arg1: i32) -> (i32, i32, i32) {
    %c0_i32 = arith.constant 0 : i32
    %c0_i32_0 = arith.constant 0 : i32
    %c0_i32_1 = arith.constant 0 : i32
    return %arg1, %c0_i32, %c0_i32_0 : i32, i32, i32
  }
  func.func @transform_4(%arg0: i32, %arg1: i32) -> (i32, i32, i32) {
    %c0_i32 = arith.constant 0 : i32
    %c0_i32_0 = arith.constant 0 : i32
    %c0_i32_1 = arith.constant 0 : i32
    return %arg1, %c0_i32, %c0_i32_0 : i32, i32, i32
  }
  func.func @transform_5(%arg0: i32, %arg1: i32) -> (i32, i32, i32) {
    %c0_i32 = arith.constant 0 : i32
    %c0_i32_0 = arith.constant 0 : i32
    %c0_i32_1 = arith.constant 0 : i32
    return %arg1, %c0_i32, %c0_i32_0 : i32, i32, i32
  }
  func.func @transform_6(%arg0: i32, %arg1: i32) -> (i32, i32, i32) {
    %c0_i32 = arith.constant 0 : i32
    %c0_i32_0 = arith.constant 0 : i32
    %c0_i32_1 = arith.constant 0 : i32
    return %arg1, %c0_i32, %c0_i32_0 : i32, i32, i32
  }
  func.func @transform_7(%arg0: i32, %arg1: i32) -> (i32, i32, i32) {
    %c0_i32 = arith.constant 0 : i32
    %c0_i32_0 = arith.constant 0 : i32
    %c0_i32_1 = arith.constant 0 : i32
    return %arg1, %c0_i32, %c0_i32_0 : i32, i32, i32
  }
  func.func @transform_8(%arg0: i32, %arg1: i32) -> (i32, i32, i32) {
    %c0_i32 = arith.constant 0 : i32
    %c0_i32_0 = arith.constant 0 : i32
    %c0_i32_1 = arith.constant 0 : i32
    return %arg1, %c0_i32, %c0_i32_0 : i32, i32, i32
  }
  func.func @transform_9(%arg0: i32, %arg1: i32) -> (i32, i32, i32) {
    %c0_i32 = arith.constant 0 : i32
    %c0_i32_0 = arith.constant 0 : i32
    %c0_i32_1 = arith.constant 0 : i32
    return %arg1, %c0_i32, %c0_i32_0 : i32, i32, i32
  }
  func.func @transform_10(%arg0: i32, %arg1: i32) -> (i32, i32) {
    %c0_i32 = arith.constant 0 : i32
    %c0_i32_0 = arith.constant 0 : i32
    %c0_i32_1 = arith.constant 0 : i32
    return %c0_i32, %c0_i32_0 : i32, i32
  }
  func.func @transform_11(%arg0: i32, %arg1: i32) -> (i32, i32) {
    %c0_i32 = arith.constant 0 : i32
    %c0_i32_0 = arith.constant 0 : i32
    %c0_i32_1 = arith.constant 0 : i32
    return %c0_i32, %c0_i32_0 : i32, i32
  }
  func.func @transform_12(%arg0: i32, %arg1: i32) -> (i32, i32) {
    %c0_i32 = arith.constant 0 : i32
    %c0_i32_0 = arith.constant 0 : i32
    %c0_i32_1 = arith.constant 0 : i32
    return %c0_i32, %c0_i32_0 : i32, i32
  }
  func.func @transform_13(%arg0: i32, %arg1: i32) -> (i32, i32, i32) {
    %c0_i32 = arith.constant 0 : i32
    %c0_i32_0 = arith.constant 0 : i32
    %c0_i32_1 = arith.constant 0 : i32
    return %arg0, %c0_i32, %c0_i32_0 : i32, i32, i32
  }
}

</mosaic_0001>

<bundles_post_ra>
// kernel: tile.7
= control target key start
LH: loop header
LB: loop body
LE: loop exit
PB: predicated region body
PF: predicated region fallthrough
CT: control target
= control target key end

     0   :  { %vm3_vm0 = vcmask 261120   ;;  %s120_s0 = inlined_call_operand.vmem [shape: f32[8,5,32], index: 0, kind: input, shape index: {}]   ;;  %s121_s1 = inlined_call_operand.vmem [shape: f32[40,32], index: 1, kind: output, shape index: {}]  }
   0x1   :  { %v2_v0 = vld [vmem:[%s120_s0] sm:$0x1f]   ;;  %v40_v1 = vld [vmem:[%s120_s0 + $0x8] sm:$0x1f]   ;;  %v42_v2 = vld [vmem:[%s120_s0 + $0x10] sm:$0x1f]  }
   0x2   :  { %4 = vst.msk [vmem:[%s121_s1] sm:$0x1f] %vm3_vm0, %v2_v0   ;;  %41 = vst.msk [vmem:[%s121_s1 + $0x5] sm:$0x1f] %vm3_vm0, %v40_v1   ;;  %v44_v3 = vld [vmem:[%s120_s0 + $0x18] sm:$0x1f]  }
   0x3   :  { %43 = vst.msk [vmem:[%s121_s1 + $0xa] sm:$0x1f] %vm3_vm0, %v42_v2   ;;  %v46_v4 = vld [vmem:[%s120_s0 + $0x20] sm:$0x1f]   ;;  %v48_v5 = vld [vmem:[%s120_s0 + $0x28] sm:$0x1f]  }
   0x4   :  { %45 = vst.msk [vmem:[%s121_s1 + $0xf] sm:$0x1f] %vm3_vm0, %v44_v3   ;;  %47 = vst.msk [vmem:[%s121_s1 + $0x14] sm:$0x1f] %vm3_vm0, %v46_v4   ;;  %v50_v6 = vld [vmem:[%s120_s0 + $0x30] sm:$0x1f]  }
   0x5   :  { %49 = vst.msk [vmem:[%s121_s1 + $0x19] sm:$0x1f] %vm3_vm0, %v48_v5   ;;  %v52_v7 = vld [vmem:[%s120_s0 + $0x38] sm:$0x1f]   ;;  %51 = vst.msk [vmem:[%s121_s1 + $0x1e] sm:$0x1f] %vm3_vm0, %v50_v6  }
   0x6   :  { %53 = vst.msk [vmem:[%s121_s1 + $0x23] sm:$0x1f] %vm3_vm0, %v52_v7  }

// kernel: accelerometer_forward.1
= control target key start
LH: loop header
LB: loop body
LE: loop exit
PB: predicated region body
PF: predicated region fallthrough
CT: control target
= control target key end

     0   :  { %s5321_s0 = inlined_call_operand.vmem [shape: f32[2,40,15], index: 0, kind: input, shape index: {}]   ;;  %s5322_s1 = inlined_call_operand.vmem [shape: f32[32,15], index: 1, kind: input, shape index: {}]   ;;  %s5323_s2 = inlined_call_operand.vmem [shape: f32[40,32], index: 2, kind: input, shape index: {}]   ;;  %s5324_s3 = inlined_call_operand.vmem [shape: f32[2,96,32], index: 3, kind: input, shape index: {}]   ;;  %s5325_s4 = inlined_call_operand.vmem [shape: f32[2,1,96], index: 4, kind: input, shape index: {}]   ;;  %s5326_s5 = inlined_call_operand.vmem [shape: f32[2,32,32], index: 5, kind: input, shape index: {}]   ;;  %s5327_s6 = inlined_call_operand.vmem [shape: f32[2,6,32], index: 6, kind: input, shape index: {}]   ;;  %s5328_s7 = inlined_call_operand.vmem [shape: f32[2,1,128], index: 7, kind: input, shape index: {}]   ;;  %s5329_s8 = inlined_call_operand.vmem [shape: f32[2,128,32], index: 8, kind: input, shape index: {}]   ;;  %s5330_s9 = inlined_call_operand.vmem [shape: f32[2,32,128], index: 9, kind: input, shape index: {}]   ;;  %s5331_s10 = inlined_call_operand.vmem [shape: f32[40,32], index: 10, kind: input, shape index: {}]   ;;  %s5332_s11 = inlined_call_operand.vmem [shape: f32[40,3], index: 11, kind: input, shape index: {}]   ;;  %s5333_s12 = inlined_call_operand.vmem [shape: f32[1,3], index: 12, kind: input, shape index: {}]   ;;  %s5334_s13 = inlined_call_operand.hbm [shape: f32[2,1,3], index: 13, kind: output, shape index: {}]  }
   0x1   :  { %5348 = sst [smem:[#allocation17_spill]] %s5321_s0 }
   0x2   :  { %5349 = sst [smem:[#allocation18_spill]] %s5324_s3 }
   0x3   :  { %5350 = sst [smem:[#allocation19_spill]] %s5326_s5 }
   0x4   :  { %5351 = sst [smem:[#allocation20_spill]] %s5332_s11 }
   0x5   :  { %5352 = sst [smem:[#allocation21_spill]] %s5333_s12 }
   0x6   :  { %5353 = sst [smem:[#allocation22_spill]] %s5334_s13 }
   0x7   :  { %18 = vsyncpa [#allocation4], 0 }
   0x8   :  { %20 = vsyncpa [#allocation4 + $0x1], 0  ;;  %s4308_s25 = smov 0   ;;  %s4310_s26 = smov 0  }
   0x9   :  { %s4312_s27 = smov 0   ;;  %s4314_s28 = smov 0  }
   0xa   :  { %s4316_s29 = smov 0   ;;  %s4318_s30 = smov 0  }
   0xb   :  { %s4320_s14 = smov 0   ;;  %s4322_s15 = smov 0  }
   0xc LB: > { %5354 = sst [smem:[#allocation6_spill]] %s4187_s25  ;;  %s3050_s16 = sadd.s32 4294967295, %s4215_s15   ;;  %s4215_s15 = sphi %s4322_s15, %s26_s15   ;;  %s4211_s14 = sphi %s4320_s14, %s5392_s14   ;;  %s4207_s30 = sphi %s4318_s30, %s5395_s30   ;;  %s4203_s29 = sphi %s4316_s29, %s5390_s29   ;;  %s4199_s28 = sphi %s4314_s28, %s5389_s28   ;;  %s4195_s27 = sphi %s4312_s27, %s5388_s27   ;;  %s4191_s26 = sphi %s4310_s26, %s5394_s26   ;;  %s4187_s25 = sphi %s4308_s25, %s5393_s25  }
   0xd   : > { %5355 = sst [smem:[#allocation7_spill]] %s4195_s27  ;;  %s3051_s17 = sadd.s32 4294967294, %s4215_s15  }
   0xe   : > { %5356 = sst [smem:[#allocation8_spill]] %s4203_s29  ;;  %s35_s18 = sadd.s32 1, %s4207_s30 }
   0xf   : > { %5357 = sst [smem:[#allocation9_spill]] %s4207_s30  ;;  %p36_p0 = scmp.ge.s32.totalorder %s35_s18, 2 }
  0x10   : > { %5358 = sst [smem:[#allocation10_spill]] %s4211_s14  ;;  %s38_s19 = sadd.s32 1, %s4211_s14 }
  0x11   : > { %5359 = sst [smem:[#allocation11_spill]] %s4215_s15  ;;  %p368_p1 = scmp.ne.s32.totalorder %s4195_s27, %s4191_s26 }
  0x12   : > { %p369_p2 = scmp.eq.s32.totalorder %s3050_s16, 3  ;;  %s5397_s18 = smov (%p36_p0, %s35_s18), 0 }
  0x13   : > { %5360 = sst [smem:[#allocation12_spill]] %s5397_s18  ;;  %s5399_s19 = smov (!%p36_p0, %s38_s19), %s4211_s14 }
  0x14   : > { %p4357_p3 = por %p369_p2, %p368_p1  ;;  %p374_p4 = scmp.ne.s32.totalorder %s4191_s26, %s4187_s25 }
  0x15   : > { %p40_p5 = scmp.ge.s32.totalorder %s5399_s19, 2  ;;  %p375_p6 = scmp.eq.s32.totalorder %s3051_s17, 3 }
  0x16   : > { %s5361_s20 = scalar_select %p4357_p3, 1, 0 }
  0x17   : > { %p3054_p7 = scmp.ge.s32.totalorder %s4215_s15, 1  ;;  %p467_p8 = scmp.lt.s32.totalorder %s4215_s15, 5 }
  0x18   : > { %5362 = sst [smem:[#allocation13_spill]] %s5361_s20  ;;  %s5401_s19 = smov (%p40_p5, %s5399_s19), 0 }
  0x19   : > { %5363 = sst [smem:[#allocation14_spill]] %s5401_s19  ;;  %p4367_p9 = por %p375_p6, %p374_p4 }
  0x1a   : > { %p468_p10 = pnand %p3054_p7, %p467_p8  ;;  %s355_s22 = ssub.s32 %s4211_s14, %s5401_s19 }
  0x1b   : > { %s5364_s21 = scalar_select %p4367_p9, 1, 0 }
  0x1c   : > { %s358_s23 = sadd.s32 1, %s4195_s27  ;;  %p356_p11 = scmp.eq.s32.totalorder %s355_s22, 0 }
  0x1d   : > { %5365 = sst [smem:[#allocation15_spill]] %s5364_s21  ;;  %471 = sbr.rel (%p468_p10) target bundleno = 3121 (0xc31), region = 72 }
  0x1e   : > { %s4375_s24 = scalar_select %p356_p11, %s4195_s27, %s358_s23  }
  0x1f   : > { %p540_p12 = scmp.lt.s32.totalorder (!%p468_p10), %s4203_s29, 1  ;;  %p545_p13 = scmp.lt.s32.totalorder (!%p468_p10), %s4199_s28, 1 }
  0x20   : > { %5366 = sst [smem:[#allocation16_spill]] %s4375_s24  ;;  %s5367_s0 = sld [smem:[#allocation17_spill]] (!%p468_p10) }
  0x21   : > { %s5368_s3 = sld [smem:[#allocation18_spill]] (!%p468_p10)  ;;  %s5369_s5 = sld [smem:[#allocation19_spill]] (!%p468_p10) }
  0x22   : > { %p3064_p0 = scmp.ne.s32.totalorder (!%p468_p10), %s4199_s28, 0 }
  0x24   : > { %s541_s17 = scalar_select %p540_p12, %s4203_s29, 1 }
  0x25   : > { %s4382_s18 = scalar_select %p545_p13, %s4199_s28, 1 }
  0x26   : > { %s3832_s22 = smul.u32 40, %s541_s17  ;;  %v584_v0 = vld [vmem:[%s5322_s1] sm:$0xff] (!%p3064_p0)  ;;  %v585_v1 = vld [vmem:[%s5322_s1 + $0x8] sm:$0xff] (!%p3064_p0)  ;;  %vm593_vm0 = vcmask (!%p3064_p0), 121856   ;;  %v4217_v2 = vmov (!%p3064_p0), 0.0|0.0   ;;  %vm4218_vm2 = vmmov (!%p3064_p0), 0  }
  0x27   : > { %s3833_s23 = smul.u32 96, %s4382_s18  ;;  %s3187_s21 = sshll.u32 %s4382_s18, 5  ;;  %3690 = vmatprep.subr.bf16.mxu0 (!%p3064_p0), %v4217_v2  ;;  %v3691_v3 = vpack.c.bf16 (!%p3064_p0), %v585_v1, %v584_v0  ;;  %vm3692_vm1 = vmpackc.low (!%p3064_p0), %vm593_vm0, %vm593_vm0  ;;  %3824 = vmatprep.subr.bf16.mxu1 (!%p3064_p0), %v4217_v2  ;;  %v4219_v4 = vmov (!%p3064_p0), 0.0   ;;  %v586_v5 = vld [vmem:[%s5322_s1 + $0x10] sm:$0xff] (!%p3064_p0)  ;;  %v587_v6 = vld [vmem:[%s5322_s1 + $0x18] sm:$0xff] (!%p3064_p0)  ;;  %vm711_vm3 = vcmask (!%p3064_p0), 261120  }
  0x28   : > { %s4392_s27 = scalar_lea.vmem %s5367_s0, %s3832_s22  ;;  %s4403_s17 = scalar_lea.vmem %s5369_s5, %s3187_s21  ;;  %3343 = vmatprep.mubr.msk.f32.mxu0 (!%p3064_p0), %vm4218_vm2, %v4219_v4  ;;  %3352 = vmatprep.mubr.msk.f32.mxu1 (!%p3064_p0), %vm4218_vm2, %v4219_v4  ;;  %v3695_v7 = vpack.c.bf16 (!%p3064_p0), %v587_v6, %v586_v5  ;;  %v588_v13 = vld [vmem:[%s5323_s2] sm:$0xff] (!%p3064_p0)  ;;  %v591_v14 = vld [vmem:[%s5323_s2 + $0x18] sm:$0xff] (!%p3064_p0)  ;;  %v589_v21 = vld [vmem:[%s5323_s2 + $0x8] sm:$0xff] (!%p3064_p0) }
  0x29   : > { %s4398_s13 = scalar_lea.vmem %s5368_s3, %s3833_s23  ;;  %s3059_s12 = sshll.u32 %s4382_s18, 3  ;;  %3693 = vmatpush3.bf16.xpose.msk.msra.mxu0 (!%p3064_p0), %vm3692_vm1, %v3691_v3  ;;  %3826 = vmatpush3.bf16.xpose.msk.msra.mxu1 (!%p3064_p0), %vm3692_vm1, %v3691_v3  ;;  %v579_v8 = vld [vmem:[%s4392_s27] sm:$0xff] (!%p3064_p0)  ;;  %v582_v9 = vld [vmem:[%s4392_s27 + $0x18] sm:$0xff] (!%p3064_p0)  ;;  %v580_v10 = vld [vmem:[%s4392_s27 + $0x8] sm:$0xff] (!%p3064_p0) }
  0x2a   : > { %s564_s19 = scalar_lea.vmem %s5328_s7, %s4382_s18  ;;  %s4413_s16 = scalar_lea.vmem %s5327_s6, %s3059_s12  ;;  %3694 = vmatprep.subr.bf16.mxu0 (!%p3064_p0), %v4217_v2  ;;  %3825 = vmatprep.subr.bf16.mxu1 (!%p3064_p0), %v4217_v2  ;;  %v583_v11 = vld [vmem:[%s4392_s27 + $0x20] sm:$0xff] (!%p3064_p0)  ;;  %v581_v12 = vld [vmem:[%s4392_s27 + $0x10] sm:$0xff] (!%p3064_p0) }
  0x2b   : > { %s3188_s22 = sshll.u32 %s4382_s18, 7  ;;  %s4424_s20 = scalar_lea.vmem %s5330_s9, %s3187_s21  ;;  %v592_v22 = vld [vmem:[%s5323_s2 + $0x20] sm:$0xff] (!%p3064_p0)  ;;  %v590_v29 = vld [vmem:[%s5323_s2 + $0x10] sm:$0xff] (!%p3064_p0) }
  0x2c   : > { %s4419_s15 = scalar_lea.vmem %s5329_s8, %s3188_s22  ;;  %s5370_s3 = sand.u32 1, %s4191_s26  }
  0x2d   : > { %s4428_s5 = scalar_lea.vmem [#allocation3], %s5370_s3  ;;  %578 = sbr.rel (%p3064_p0) target bundleno = 279 (0x117), region = 76 }
  0x31   : > { %3697 = vmatpush3.bf16.xpose.msk.msra.mxu0 (!%p3064_p0), %vm3692_vm1, %v3695_v7  ;;  %3827 = vmatpush3.bf16.xpose.msk.msra.mxu1 (!%p3064_p0), %vm3692_vm1, %v3695_v7 }
  0x38   : > { %3344 = vmatmul.mubr.msk.f32.vlgmr.msra.gmra.mrb[0].mxu0 %vm593_vm0, %v579_v8  ;;  %3353 = vmatmul.mubr.msk.f32.vlgmr.msra.gmra.mrb[0].mxu1 %vm593_vm0, %v582_v9 }
  0x39   : > { %3346 = vmatprep.mubr.msk.f32.mxu0 %vm4218_vm2, %v4219_v4  ;;  %3355 = vmatprep.mubr.msk.f32.mxu1 %vm4218_vm2, %v4219_v4 }
  0x3c   : > { %3347 = vmatmul.mubr.msk.f32.gmra.mrb[2].mxu0 %vm593_vm0, %v580_v10  ;;  %3356 = vmatmul.mubr.msk.f32.gmra.mrb[2].mxu1 %vm593_vm0, %v583_v11 }
  0x3d   : > { %3349 = vmatprep.mubr.msk.f32.mxu0 %vm4218_vm2, %v4219_v4 }
  0x40   : > { %3350 = vmatmul.mubr.msk.f32.gmra.mrb[4].mxu0 %vm593_vm0, %v581_v12 }
 0x10b   : > { %v687_v15 = vpop.f32.mrb[0].mxu0  ;;  %v702_v16 = vpop.f32.mrb[0].mxu1 }
 0x10c   : > { %v688_v17 = vadd.f32 %v687_v15, %v588_v13  ;;  %v3345_v18 = vpop.f32.mrb[1].mxu0  ;;  %v703_v19 = vadd.f32 %v702_v16, %v591_v14  ;;  %v3354_v20 = vpop.f32.mrb[1].mxu1 }
 0x10e   : > { %712 = vst.msk [vmem:[#allocation2] sm:$0xff] %vm711_vm3, %v688_v17  ;;  %715 = vst.msk [vmem:[#allocation2 + $0x18] sm:$0xff] %vm711_vm3, %v703_v19 }
 0x10f   : > { %v692_v23 = vpop.f32.mrb[2].mxu0  ;;  %v707_v24 = vpop.f32.mrb[2].mxu1 }
 0x110   : > { %v693_v25 = vadd.f32 %v692_v23, %v589_v21  ;;  %v3348_v26 = vpop.f32.mrb[3].mxu0  ;;  %v708_v27 = vadd.f32 %v707_v24, %v592_v22  ;;  %v3357_v28 = vpop.f32.mrb[3].mxu1 }
 0x112   : > { %713 = vst.msk [vmem:[#allocation2 + $0x8] sm:$0xff] %vm711_vm3, %v693_v25  ;;  %716 = vst.msk [vmem:[#allocation2 + $0x20] sm:$0xff] %vm711_vm3, %v708_v27 }
 0x113   : > { %v697_v30 = vpop.f32.mrb[4].mxu0 }
 0x114   : > { %v698_v31 = vadd.f32 %v697_v30, %v590_v29  ;;  %v3351_v32 = vpop.f32.mrb[5].mxu0 }
 0x116   : > { %714 = vst.msk [vmem:[#allocation2 + $0x10] sm:$0xff] %vm711_vm3, %v698_v31 }
 0x117 PF: > { %v717_v33 = vld [vmem:[#allocation2] sm:$0xff]  ;;  %vm761_vm4 = vcmask 261120   ;;  %v720_v38 = vld [vmem:[#allocation2 + $0x18] sm:$0xff]  ;;  %v723_v44 = vld [vmem:[%s4398_s13 + $0x8] sm:$0xff]  ;;  %v4220_v46 = vmov 0.0|0.0   ;;  %vm4221_vm6 = vmmov 0   ;;  %v828_v27 = vlaneseq  ;;  %s5373_s21 = scalar_lea.vmem %s5325_s4, %s4382_s18 }
 0x118   : > { %v762_v36 = vsel %vm761_vm4, %v717_v33, 0.0  ;;  %v771_v40 = vsel %vm761_vm4, %v720_v38, 0.0  ;;  %v722_v43 = vld [vmem:[%s4398_s13] sm:$0xff]  ;;  %vm4489_vm5 = vmpackc.low %vm761_vm4, %vm761_vm4  ;;  %3698 = vmatprep.subr.bf16.mxu0 %v4220_v46  ;;  %3722 = vmatprep.subr.bf16.mxu1 %v4220_v46  ;;  %v724_v48 = vld [vmem:[%s4398_s13 + $0x10] sm:$0xff]  ;;  %v4222_v24 = vmov 0.0   ;;  %s4223_s24 = smov 96  }
 0x119   : > { %v718_v35 = vld [vmem:[#allocation2 + $0x8] sm:$0xff]  ;;  %763 = vadd.xlane.f32.xlu0 %v762_v36  ;;  %v721_v41 = vld [vmem:[#allocation2 + $0x20] sm:$0xff]  ;;  %v3699_v47 = vpack.c.bf16 %v723_v44, %v722_v43  ;;  %v725_v49 = vld [vmem:[%s4398_s13 + $0x18] sm:$0xff]  ;;  %3382 = vmatprep.mubr.msk.f32.mxu0 %vm4221_vm6, %v4222_v24  ;;  %s4224_s22 = smov 88   ;;  %s4225_s25 = smov 80   ;;  %vm1128_vm7 = vcmask 64512  }
 0x11a   : > { %v765_v39 = vsel %vm761_vm4, %v718_v35, 0.0  ;;  %v774_v42 = vsel %vm761_vm4, %v721_v41, 0.0  ;;  %v3703_v50 = vpack.c.bf16 %v725_v49, %v724_v48  ;;  %v726_v51 = vld [vmem:[%s4398_s13 + $0x20] sm:$0xff]  ;;  %v727_v52 = vld [vmem:[%s4398_s13 + $0x28] sm:$0xff]  ;;  %v728_v54 = vld [vmem:[%s4398_s13 + $0x30] sm:$0xff]  ;;  %3407 = vmatprep.mubr.msk.f32.mxu1 %vm4221_vm6, %v4222_v24  ;;  %s4226_s23 = smov 120  }
 0x11b   : > { %3701 = vmatpush3.bf16.xpose.msk.msra.mxu0 %vm4489_vm5, %v3699_v47  ;;  %v3707_v53 = vpack.c.bf16 %v727_v52, %v726_v51  ;;  %v729_v55 = vld [vmem:[%s4398_s13 + $0x38] sm:$0xff]  ;;  %v730_v18 = vld [vmem:[%s4398_s13 + $0x40] sm:$0xff]  ;;  %v731_v19 = vld [vmem:[%s4398_s13 + $0x48] sm:$0xff]  ;;  %s4227_s29 = smov 72   ;;  %s4228_s11 = smov 112   ;;  %vm1569_vm9 = vcmask 326656  }
 0x11c   : > { %3702 = vmatprep.subr.bf16.mxu0 %v4220_v46  ;;  %v3711_v56 = vpack.c.bf16 %v729_v55, %v728_v54  ;;  %v3715_v20 = vpack.c.bf16 %v731_v19, %v730_v18  ;;  %v732_v21 = vld [vmem:[%s4398_s13 + $0x50] sm:$0xff]  ;;  %v733_v22 = vld [vmem:[%s4398_s13 + $0x58] sm:$0xff]  ;;  %s4229_s12 = smov 104   ;;  %s4230_s27 = smov 56   ;;  %vm4636_vm8 = vmpackc.low %vm1128_vm7, %vm1128_vm7  ;;  %vm2295_vm10 = vcmask 130048   ;;  %vm2301_vm11 = vcmask 195584  }
 0x11d   : > { %v719_v34 = vld [vmem:[#allocation2 + $0x10] sm:$0xff]  ;;  %766 = vadd.xlane.f32.xlu0 %v765_v39  ;;  %v3719_v23 = vpack.c.bf16 %v733_v22, %v732_v21  ;;  %s4231_s30 = smov 64   ;;  %s4232_s14 = smov 40  }
 0x11e   : > { %v768_v37 = vsel %vm761_vm4, %v719_v34, 0.0  ;;  %s4233_s0 = smov 48   ;;  %s4234_s13 = smov 8  }
 0x11f   : > { %769 = vadd.xlane.f32.xlu1 %v768_v37  ;;  %s4235_s3 = smov 16   ;;  %p3183_p1 = scmp.ne.s32.totalorder %s4199_s28, 1 }
 0x120   : > { %vm2873_vm12 = vcmask (!%p3183_p1), 23552   ;;  %vm2891_vm13 = vcmask (!%p3183_p1), 16384  }
 0x121   : > { %775 = vadd.xlane.f32.xlu0 %v774_v42  ;;  %v739_v42 = vld [vmem:[%s4413_s16] sm:$0x3f] }
 0x123   : > { %772 = vadd.xlane.f32.xlu1 %v771_v40  ;;  %3705 = vmatpush3.bf16.xpose.msk.msra.mxu0 %vm4489_vm5, %v3703_v50 }
 0x124   : > { %3706 = vmatprep.subr.bf16.mxu0 %v4220_v46 }
 0x12b   : > { %3709 = vmatpush3.bf16.xpose.msk.msra.mxu0 %vm4489_vm5, %v3707_v53 }
 0x12c   : > { %3710 = vmatprep.subr.bf16.mxu0 %v4220_v46 }
 0x133   : > { %3713 = vmatpush3.bf16.xpose.msk.msra.mxu0 %vm4489_vm5, %v3711_v56 }
 0x134   : > { %3714 = vmatprep.subr.bf16.mxu0 %v4220_v46 }
 0x13b   : > { %3717 = vmatpush3.bf16.xpose.msk.msra.mxu0 %vm4489_vm5, %v3715_v20 }
 0x13c   : > { %3718 = vmatprep.subr.bf16.mxu0 %v4220_v46 }
 0x143   : > { %3721 = vmatpush3.bf16.xpose.msk.msra.mxu0 %vm4489_vm5, %v3719_v23 }
 0x144   : > { %3760 = vmatprep.subr.bf16.mxu0 %v4220_v46 }
 0x1a6   : > { %v764_v57 = vpop.xlane.xlu0 %763 }
 0x1a7   : > { %v778_v59 = vmul.f32 0.03125, %v764_v57 }
 0x1a9   : > { %v4513_v61 = vsub.f32 %v717_v33, %v778_v59  ;;  %v4552_v33 = vshrl.u32 %v828_v27, 7 }
 0x1aa   : > { %v767_v63 = vpop.xlane.xlu0 %766 }
 0x1ab   : > { %v779_v1 = vmul.f32 0.03125, %v767_v63  ;;  %v788_v3 = vmul.f32 %v4513_v61, %v4513_v61  ;;  %v830_v40 = vsub.s32 0, %v4552_v33  ;;  %v839_v44 = vsub.s32 1, %v4552_v33 }
 0x1ac   : > { %v770_v58 = vpop.xlane.xlu1 %769 }
 0x1ad   : > { %v780_v60 = vmul.f32 0.03125, %v770_v58  ;;  %v4521_v5 = vsub.f32 %v718_v35, %v779_v1  ;;  %v793_v7 = vsel %vm761_vm4, %v788_v3, 0.0  ;;  %v831_v47 = vrot.slane %v739_v42, %v830_v40 }
 0x1ae   : > { %794 = vadd.xlane.f32.xlu1 %v793_v7  ;;  %v776_v8 = vpop.xlane.xlu0 %775  ;;  %v840_v50 = vrot.slane %v739_v42, %v839_v44  ;;  %v3074_v7 = vld [vmem:[%s5373_s21] ss:$0 sm:$0xff]  ;;  %s5378_s21 = sld [smem:[#allocation21_spill]] (!%p3183_p1) }
 0x1af   : > { %v4515_v62 = vsub.f32 %v719_v34, %v780_v60  ;;  %v782_v9 = vmul.f32 0.03125, %v776_v8  ;;  %v789_v11 = vmul.f32 %v4521_v5, %v4521_v5 }
 0x1b0   : > { %v773_v0 = vpop.xlane.xlu1 %772 }
 0x1b1   : > { %v781_v2 = vmul.f32 0.03125, %v773_v0  ;;  %v790_v4 = vmul.f32 %v4515_v62, %v4515_v62  ;;  %v4531_v13 = vsub.f32 %v721_v41, %v782_v9  ;;  %v796_v14 = vsel %vm761_vm4, %v789_v11, 0.0 }
 0x1b2   : > { %797 = vadd.xlane.f32.xlu0 %v796_v14 }
 0x1b3   : > { %v4523_v6 = vsub.f32 %v720_v38, %v781_v2  ;;  %v799_v10 = vsel %vm761_vm4, %v790_v4, 0.0  ;;  %v792_v16 = vmul.f32 %v4531_v13, %v4531_v13 }
 0x1b4   : > { %800 = vadd.xlane.f32.xlu1 %v799_v10 }
 0x1b5   : > { %v791_v12 = vmul.f32 %v4523_v6, %v4523_v6  ;;  %v805_v17 = vsel %vm761_vm4, %v792_v16, 0.0 }
 0x1b7   : > { %v802_v15 = vsel %vm761_vm4, %v791_v12, 0.0 }
 0x1b8   : > { %803 = vadd.xlane.f32.xlu0 %v802_v15  ;;  %806 = vadd.xlane.f32.xlu1 %v805_v17 }
 0x23b   : > { %v795_v25 = vpop.xlane.xlu1 %794 }
 0x23c   : > { %v808_v26 = vmul.f32 0.03125, %v795_v25 }
 0x23e   : > { %v813_v28 = vadd.f32 1e-05, %v808_v26 }
 0x23f   : > { %v798_v30 = vpop.xlane.xlu0 %797 }
 0x240   : > { %4005 = vrsqrt.f32 %v813_v28  ;;  %v809_v32 = vmul.f32 0.03125, %v798_v30 }
 0x241   : > { %v801_v29 = vpop.xlane.xlu1 %800 }
 0x242   : > { %v810_v31 = vmul.f32 0.03125, %v801_v29  ;;  %v814_v35 = vadd.f32 1e-05, %v809_v32 }
 0x244   : > { %v815_v34 = vadd.f32 1e-05, %v810_v31 }
 0x245   : > { %v807_v36 = vpop.xlane.xlu1 %806  ;;  %v804_v37 = vpop.xlane.xlu0 %803 }
 0x246   : > { %4007 = vrsqrt.f32 %v815_v34  ;;  %v812_v38 = vmul.f32 0.03125, %v807_v36  ;;  %v811_v39 = vmul.f32 0.03125, %v804_v37 }
 0x247   : > { %4009 = vrsqrt.f32 %v814_v35 }
 0x248   : > { %v816_v41 = vadd.f32 1e-05, %v811_v39  ;;  %v817_v43 = vadd.f32 1e-05, %v812_v38 }
 0x24a   : > { %4011 = vrsqrt.f32 %v816_v41  ;;  %v4006_v48 = vpop.eup %4005 }
 0x24b   : > { %4013 = vrsqrt.f32 %v817_v43  ;;  %v823_v49 = vmul.f32 %v4006_v48, %v4513_v61 }
 0x24d   : > { %v832_v51 = vmul.f32 %v831_v47, %v823_v49 }
 0x24f   : > { %v841_v54 = vadd.f32 %v840_v50, %v832_v51 }
 0x250   : > { %v4008_v52 = vpop.eup %4007 }
 0x251   : > { %v4010_v53 = vpop.eup %4009  ;;  %v825_v56 = vmul.f32 %v4008_v52, %v4515_v62  ;;  %3383 = vmatmul.mubr.msk.f32.vlgmr.msra.gmra.mrb[0].mxu0 %vm761_vm4, %v841_v54 }
 0x252   : > { %v824_v55 = vmul.f32 %v4010_v53, %v4521_v5  ;;  %3385 = vmatprep.mubr.msk.f32.mxu0 %vm4221_vm6, %v4222_v24 }
 0x253   : > { %v834_v60 = vmul.f32 %v831_v47, %v825_v56 }
 0x254   : > { %v833_v57 = vmul.f32 %v831_v47, %v824_v55  ;;  %v4012_v58 = vpop.eup %4011 }
 0x255   : > { %v826_v61 = vmul.f32 %v4012_v58, %v4523_v6  ;;  %v4014_v63 = vpop.eup %4013  ;;  %v843_v0 = vadd.f32 %v840_v50, %v834_v60 }
 0x256   : > { %v842_v59 = vadd.f32 %v840_v50, %v833_v57  ;;  %v827_v1 = vmul.f32 %v4014_v63, %v4531_v13 }
 0x257   : > { %v835_v62 = vmul.f32 %v831_v47, %v826_v61 }
 0x258   : > { %3386 = vmatmul.mubr.msk.f32.gmra.mrb[2].mxu0 %vm761_vm4, %v842_v59  ;;  %v836_v3 = vmul.f32 %v831_v47, %v827_v1 }
 0x259   : > { %3388 = vmatprep.mubr.msk.f32.mxu0 %vm4221_vm6, %v4222_v24  ;;  %v844_v2 = vadd.f32 %v840_v50, %v835_v62 }
 0x25a   : > { %v845_v4 = vadd.f32 %v840_v50, %v836_v3 }
 0x25c   : > { %3389 = vmatmul.mubr.msk.f32.gmra.mrb[4].mxu0 %vm761_vm4, %v843_v0 }
 0x25d   : > { %3391 = vmatprep.mubr.msk.f32.mxu0 %vm4221_vm6, %v4222_v24 }
 0x260   : > { %3392 = vmatmul.mubr.msk.f32.gmra.mrb[6].mxu0 %vm761_vm4, %v844_v2 }
 0x261   : > { %3394 = vmatprep.mubr.msk.f32.mxu0 %vm4221_vm6, %v4222_v24 }
 0x264   : > { %3395 = vmatmul.mubr.msk.f32.gmra.mrb[8].mxu0 %vm761_vm4, %v845_v4 }
 0x265   : > { %3532 = vmatprep.mubr.msk.f32.mxu0 %vm4221_vm6, %v4222_v24 }
 0x324   : > { %v969_v5 = vpop.f32.mrb[0].mxu0 }
 0x325   : > { %v3384_v6 = vpop.f32.mrb[1].mxu0  ;;  %v4582_v9 = vadd.f32 %v3074_v7, %v969_v5 }
 0x32b   : > { %v974_v8 = vpop.f32.mrb[2].mxu0 }
 0x32c   : > { %v4584_v10 = vadd.f32 %v3074_v7, %v974_v8  ;;  %v3387_v11 = vpop.f32.mrb[3].mxu0 }
 0x32e   : > { %v4588_v12 = vpack.i.bf16 %v4584_v10, %v4582_v9 }
 0x32f   : > { %v979_v13 = vpop.f32.mrb[4].mxu0 }
 0x330   : > { %3926 = vrot.lane.b32.xlu0 %v4588_v12, %s4223_s24  ;;  %v3390_v14 = vpop.f32.mrb[5].mxu0  ;;  %v4591_v16 = vadd.f32 %v3074_v7, %v979_v13 }
 0x333   : > { %v984_v15 = vpop.f32.mrb[6].mxu0 }
 0x334   : > { %v4593_v17 = vadd.f32 %v3074_v7, %v984_v15  ;;  %v3393_v18 = vpop.f32.mrb[7].mxu0 }
 0x336   : > { %v4597_v19 = vpack.i.bf16 %v4593_v17, %v4591_v16 }
 0x337   : > { %v989_v20 = vpop.f32.mrb[8].mxu0 }
 0x338   : > { %3941 = vrot.lane.b32.xlu0 %v4597_v19, %s4224_s22  ;;  %3931 = vrot.lane.b32.xlu1 %v4597_v19, %s4223_s24  ;;  %v3396_v21 = vpop.f32.mrb[9].mxu0  ;;  %v4601_v22 = vadd.f32 %v3074_v7, %v989_v20 }
 0x33c   : > { %3946 = vrot.lane.b32.xlu0 %v4588_v12, %s4225_s25  ;;  %1036 = vrot.lane.b32.xlu1 %v4601_v22, %s4223_s24 }
 0x340   : > { %1000 = vrot.lane.b32.xlu0 %v4584_v10, %s4226_s23  ;;  %3936 = vrot.lane.b32.xlu1 %v4588_v12, %s4224_s22 }
 0x344   : > { %1002 = vrot.lane.b32.xlu0 %v4591_v16, %s4226_s23  ;;  %1046 = vrot.lane.b32.xlu1 %v4601_v22, %s4224_s22 }
 0x348   : > { %1006 = vrot.lane.b32.xlu0 %v4601_v22, %s4226_s23  ;;  %998 = vrot.lane.b32.xlu1 %v4582_v9, %s4226_s23 }
 0x34c   : > { %3956 = vrot.lane.b32.xlu0 %v4588_v12, %s4227_s29  ;;  %3951 = vrot.lane.b32.xlu1 %v4597_v19, %s4225_s25 }
 0x350   : > { %1010 = vrot.lane.b32.xlu0 %v4584_v10, %s4228_s11  ;;  %1004 = vrot.lane.b32.xlu1 %v4593_v17, %s4226_s23 }
 0x354   : > { %1012 = vrot.lane.b32.xlu0 %v4591_v16, %s4228_s11  ;;  %1056 = vrot.lane.b32.xlu1 %v4601_v22, %s4225_s25 }
 0x358   : > { %1016 = vrot.lane.b32.xlu0 %v4601_v22, %s4228_s11  ;;  %1008 = vrot.lane.b32.xlu1 %v4582_v9, %s4228_s11 }
 0x35c   : > { %1018 = vrot.lane.b32.xlu0 %v4582_v9, %s4229_s12  ;;  %3961 = vrot.lane.b32.xlu1 %v4597_v19, %s4227_s29 }
 0x360   : > { %1022 = vrot.lane.b32.xlu0 %v4591_v16, %s4229_s12  ;;  %1014 = vrot.lane.b32.xlu1 %v4593_v17, %s4228_s11 }
 0x364   : > { %1026 = vrot.lane.b32.xlu0 %v4601_v22, %s4229_s12  ;;  %1066 = vrot.lane.b32.xlu1 %v4601_v22, %s4227_s29 }
 0x368   : > { %3971 = vrot.lane.b32.xlu0 %v4588_v12, %s4230_s27  ;;  %1020 = vrot.lane.b32.xlu1 %v4584_v10, %s4229_s12 }
 0x36c   : > { %3976 = vrot.lane.b32.xlu0 %v4597_v19, %s4231_s30  ;;  %1024 = vrot.lane.b32.xlu1 %v4593_v17, %s4229_s12 }
 0x370   : > { %1076 = vrot.lane.b32.xlu0 %v4601_v22, %s4231_s30  ;;  %3966 = vrot.lane.b32.xlu1 %v4588_v12, %s4231_s30 }
 0x374   : > { %1091 = vrot.lane.b32.xlu0 %v4601_v22, %s4230_s27 }
 0x3a2   : > { %v3927_v23 = vpop.permute.xlu0 %3926 }
 0x3a3   : > { %v3929_v25 = vunpack.i.h.bf16 %v3927_v23  ;;  %v3928_v26 = vunpack.i.l.bf16 %v3927_v23 }
 0x3a5   : > { %v3723_v28 = vpack.c.bf16 %v3929_v25, %v3928_v26 }
 0x3a7   : > { %3725 = vmatpush3.bf16.xpose.msk.msra.mxu1 %vm4636_vm8, %v3723_v28 }
 0x3a8   : > { %3726 = vmatprep.subr.bf16.mxu1 %v4220_v46 }
 0x3aa   : > { %v3932_v29 = vpop.permute.xlu1 %3931  ;;  %v3942_v30 = vpop.permute.xlu0 %3941 }
 0x3ab   : > { %v3934_v31 = vunpack.i.h.bf16 %v3932_v29  ;;  %v3933_v32 = vunpack.i.l.bf16 %v3932_v29  ;;  %v3944_v48 = vunpack.i.h.bf16 %v3942_v30  ;;  %v3943_v49 = vunpack.i.l.bf16 %v3942_v30 }
 0x3ad   : > { %v3727_v34 = vpack.c.bf16 %v3934_v31, %v3933_v32  ;;  %v3735_v52 = vpack.c.bf16 %v3944_v48, %v3943_v49 }
 0x3ae   : > { %v1037_v35 = vpop.permute.xlu1 %1036  ;;  %v3947_v36 = vpop.permute.xlu0 %3946 }
 0x3af   : > { %3729 = vmatpush3.bf16.xpose.msk.msra.mxu1 %vm4636_vm8, %v3727_v34  ;;  %v3949_v57 = vunpack.i.h.bf16 %v3947_v36  ;;  %v3948_v58 = vunpack.i.l.bf16 %v3947_v36 }
 0x3b0   : > { %3405 = vmatprep.subr.mxu1 %v4222_v24 }
 0x3b1   : > { %v3739_v61 = vpack.c.bf16 %v3949_v57, %v3948_v58 }
 0x3b2   : > { %v3937_v37 = vpop.permute.xlu1 %3936  ;;  %v1001_v38 = vpop.permute.xlu0 %1000 }
 0x3b3   : > { %v3939_v39 = vunpack.i.h.bf16 %v3937_v37  ;;  %v3938_v40 = vunpack.i.l.bf16 %v3937_v37 }
 0x3b5   : > { %v3731_v43 = vpack.c.bf16 %v3939_v39, %v3938_v40 }
 0x3b6   : > { %v1047_v41 = vpop.permute.xlu1 %1046  ;;  %v1003_v42 = vpop.permute.xlu0 %1002 }
 0x3b7   : > { %3406 = vmatpush3.xpose.msk.msra.mxu1 %vm1128_vm7, %v1037_v35 }
 0x3b8   : > { %3730 = vmatprep.subr.bf16.mxu1 %v4220_v46 }
 0x3ba   : > { %v999_v44 = vpop.permute.xlu1 %998  ;;  %v1007_v47 = vpop.permute.xlu0 %1006  ;;  %3408 = vmatmul.mubr.msk.f32.vlgmr.msra.gmra.mrb[0].mxu1 %vm1128_vm7, %v4582_v9 }
 0x3bb   : > { %3733 = vmatpush3.bf16.xpose.msk.msra.mxu1 %vm4636_vm8, %v3731_v43  ;;  %3410 = vmatprep.mubr.msk.f32.mxu1 %vm4221_vm6, %v4222_v24 }
 0x3bc   : > { %3734 = vmatprep.subr.bf16.mxu1 %v4220_v46 }
 0x3be   : > { %v3952_v50 = vpop.permute.xlu1 %3951  ;;  %v3957_v51 = vpop.permute.xlu0 %3956  ;;  %3411 = vmatmul.mubr.msk.f32.gmra.mrb[2].mxu1 %vm1128_vm7, %v4584_v10 }
 0x3bf   : > { %3413 = vmatprep.mubr.msk.f32.mxu1 %vm4221_vm6, %v4222_v24  ;;  %v3954_v62 = vunpack.i.h.bf16 %v3952_v50  ;;  %v3953_v1 = vunpack.i.l.bf16 %v3952_v50  ;;  %v3959_v10 = vunpack.i.h.bf16 %v3957_v51  ;;  %v3958_v11 = vunpack.i.l.bf16 %v3957_v51 }
 0x3c1   : > { %v3743_v3 = vpack.c.bf16 %v3954_v62, %v3953_v1  ;;  %v3747_v14 = vpack.c.bf16 %v3959_v10, %v3958_v11 }
 0x3c2   : > { %v1005_v53 = vpop.permute.xlu1 %1004  ;;  %v1011_v54 = vpop.permute.xlu0 %1010  ;;  %3414 = vmatmul.mubr.msk.f32.gmra.mrb[4].mxu1 %vm1128_vm7, %v4591_v16 }
 0x3c3   : > { %3737 = vmatpush3.bf16.xpose.msk.msra.mxu1 %vm4636_vm8, %v3735_v52  ;;  %3416 = vmatprep.mubr.msk.f32.mxu1 %vm4221_vm6, %v4222_v24 }
 0x3c4   : > { %3430 = vmatprep.subr.mxu1 %v4222_v24 }
 0x3c6   : > { %v1057_v55 = vpop.permute.xlu1 %1056  ;;  %v1013_v56 = vpop.permute.xlu0 %1012  ;;  %3417 = vmatmul.mubr.msk.f32.gmra.mrb[6].mxu1 %vm1128_vm7, %v4593_v17 }
 0x3c7   : > { %3419 = vmatprep.mubr.msk.f32.mxu1 %vm4221_vm6, %v4222_v24 }
 0x3ca   : > { %v1009_v59 = vpop.permute.xlu1 %1008  ;;  %v1017_v60 = vpop.permute.xlu0 %1016  ;;  %3420 = vmatmul.mubr.msk.f32.gmra.mrb[8].mxu1 %vm1128_vm7, %v4601_v22 }
 0x3cb   : > { %3431 = vmatpush3.xpose.msk.msra.mxu1 %vm1128_vm7, %v1047_v41  ;;  %3432 = vmatprep.mubr.msk.f32.mxu1 %vm4221_vm6, %v4222_v24 }
 0x3cc   : > { %3738 = vmatprep.subr.bf16.mxu1 %v4220_v46 }
 0x3ce   : > { %v1019_v63 = vpop.permute.xlu0 %1018  ;;  %3433 = vmatmul.mubr.msk.f32.vlgmr.msra.gmra.mrb[10].mxu1 %vm1128_vm7, %v999_v44  ;;  %v3962_v0 = vpop.permute.xlu1 %3961 }
 0x3cf   : > { %3741 = vmatpush3.bf16.xpose.msk.msra.mxu1 %vm4636_vm8, %v3739_v61  ;;  %3435 = vmatprep.mubr.msk.f32.mxu1 %vm4221_vm6, %v4222_v24  ;;  %v3964_v16 = vunpack.i.h.bf16 %v3962_v0  ;;  %v3963_v17 = vunpack.i.l.bf16 %v3962_v0 }
 0x3d0   : > { %3742 = vmatprep.subr.bf16.mxu1 %v4220_v46 }
 0x3d1   : > { %v3751_v20 = vpack.c.bf16 %v3964_v16, %v3963_v17 }
 0x3d2   : > { %v4682_v2 = vpop.permute.xlu0 %1022  ;;  %3436 = vmatmul.mubr.msk.f32.gmra.mrb[12].mxu1 %vm1128_vm7, %v1001_v38  ;;  %v1015_v4 = vpop.permute.xlu1 %1014 }
 0x3d3   : > { %3438 = vmatprep.mubr.msk.f32.mxu1 %vm4221_vm6, %v4222_v24 }
 0x3d6   : > { %v4687_v5 = vpop.permute.xlu0 %1026  ;;  %3439 = vmatmul.mubr.msk.f32.gmra.mrb[14].mxu1 %vm1128_vm7, %v1003_v42  ;;  %v1067_v9 = vpop.permute.xlu1 %1066 }
 0x3d7   : > { %3745 = vmatpush3.bf16.xpose.msk.msra.mxu1 %vm4636_vm8, %v3743_v3  ;;  %3441 = vmatprep.mubr.msk.f32.mxu1 %vm4221_vm6, %v4222_v24 }
 0x3d8   : > { %3455 = vmatprep.subr.mxu1 %v4222_v24 }
 0x3da   : > { %v3972_v6 = vpop.permute.xlu0 %3971  ;;  %3442 = vmatmul.mubr.msk.f32.gmra.mrb[16].mxu1 %vm1128_vm7, %v1005_v53  ;;  %v1021_v15 = vpop.permute.xlu1 %1020 }
 0x3db   : > { %v3974_v7 = vunpack.i.h.bf16 %v3972_v6  ;;  %v3973_v8 = vunpack.i.l.bf16 %v3972_v6  ;;  %3444 = vmatprep.mubr.msk.f32.mxu1 %vm4221_vm6, %v4222_v24 }
 0x3dd   : > { %v3761_v13 = vpack.c.bf16 %v3974_v7, %v3973_v8 }
 0x3de   : > { %3445 = vmatmul.mubr.msk.f32.gmra.mrb[18].mxu1 %vm1128_vm7, %v1007_v47  ;;  %v1025_v18 = vpop.permute.xlu1 %1024  ;;  %v3977_v26 = vpop.permute.xlu0 %3976 }
 0x3df   : > { %3456 = vmatpush3.xpose.msk.msra.mxu1 %vm1128_vm7, %v1057_v55  ;;  %3762 = vmatpush3.bf16.msra.mxu0 %v3761_v13  ;;  %v3979_v27 = vunpack.i.h.bf16 %v3977_v26  ;;  %v3978_v28 = vunpack.i.l.bf16 %v3977_v26 }
 0x3e0   : > { %3457 = vmatprep.mubr.msk.f32.mxu1 %vm4221_vm6, %v4222_v24  ;;  %3746 = vmatprep.subr.bf16.mxu1 %v4220_v46 }
 0x3e1   : > { %3763 = vmatprep.subr.bf16.mxu0 %v4220_v46  ;;  %v3758_v30 = vpack.c.bf16 %v3979_v27, %v3978_v28 }
 0x3e2   : > { %3458 = vmatmul.mubr.msk.f32.vlgmr.msra.gmra.mrb[20].mxu1 %vm1128_vm7, %v1009_v59  ;;  %v3967_v21 = vpop.permute.xlu1 %3966  ;;  %v1077_v31 = vpop.permute.xlu0 %1076 }
 0x3e3   : > { %3749 = vmatpush3.bf16.xpose.msk.msra.mxu1 %vm4636_vm8, %v3747_v14  ;;  %3460 = vmatprep.mubr.msk.f32.mxu1 %vm4221_vm6, %v4222_v24  ;;  %v3969_v23 = vunpack.i.h.bf16 %v3967_v21  ;;  %v3968_v25 = vunpack.i.l.bf16 %v3967_v21 }
 0x3e4   : > { %3750 = vmatprep.subr.bf16.mxu1 %v4220_v46 }
 0x3e5   : > { %v3755_v29 = vpack.c.bf16 %v3969_v23, %v3968_v25 }
 0x3e6   : > { %3461 = vmatmul.mubr.msk.f32.gmra.mrb[22].mxu1 %vm1128_vm7, %v1011_v54 }
 0x3e7   : > { %3463 = vmatprep.mubr.msk.f32.mxu1 %vm4221_vm6, %v4222_v24 }
 0x3ea   : > { %3464 = vmatmul.mubr.msk.f32.gmra.mrb[24].mxu1 %vm1128_vm7, %v1013_v56 }
 0x3eb   : > { %3753 = vmatpush3.bf16.xpose.msk.msra.mxu1 %vm4636_vm8, %v3751_v20  ;;  %3466 = vmatprep.mubr.msk.f32.mxu1 %vm4221_vm6, %v4222_v24 }
 0x3ec   : > { %3480 = vmatprep.subr.mxu1 %v4222_v24 }
 0x3ee   : > { %3467 = vmatmul.mubr.msk.f32.gmra.mrb[26].mxu1 %vm1128_vm7, %v1015_v4 }
 0x3ef   : > { %3469 = vmatprep.mubr.msk.f32.mxu1 %vm4221_vm6, %v4222_v24 }
 0x3f2   : > { %3470 = vmatmul.mubr.msk.f32.gmra.mrb[28].mxu1 %vm1128_vm7, %v1017_v60 }
 0x3f3   : > { %3481 = vmatpush3.xpose.msk.msra.mxu1 %vm1128_vm7, %v1067_v9  ;;  %3482 = vmatprep.mubr.msk.f32.mxu1 %vm4221_vm6, %v4222_v24 }
 0x3f4   : > { %3754 = vmatprep.subr.bf16.mxu1 %v4220_v46 }
 0x3f6   : > { %3483 = vmatmul.mubr.msk.f32.vlgmr.msra.gmra.mrb[30].mxu1 %vm1128_vm7, %v1019_v63 }
 0x3f7   : > { %3756 = vmatpush3.bf16.msra.mxu1 %v3755_v29  ;;  %3485 = vmatprep.mubr.msk.f32.mxu1 %vm4221_vm6, %v4222_v24 }
 0x3f8   : > { %3757 = vmatprep.subr.bf16.mxu1 %v4220_v46 }
 0x3fa   : > { %3486 = vmatmul.mubr.msk.f32.gmra.mrb[32].mxu1 %vm1128_vm7, %v1021_v15 }
 0x3fb   : > { %3759 = vmatpush3.bf16.msra.mxu1 %v3758_v30  ;;  %3488 = vmatprep.mubr.msk.f32.mxu1 %vm4221_vm6, %v4222_v24 }
 0x3fc   : > { %3505 = vmatprep.subr.mxu1 %v4222_v24 }
 0x3fe   : > { %3489 = vmatmul.mubr.msk.f32.gmra.mrb[34].mxu1 %vm1128_vm7, %v4682_v2 }
 0x3ff   : > { %3506 = vmatpush3.msra.mxu1 %v1077_v31  ;;  %3491 = vmatprep.mubr.msk.f32.mxu1 %vm4221_vm6, %v4222_v24 }
 0x400   : > { %3766 = vmatprep.subr.bf16.mxu1 %v4220_v46 }
 0x402   : > { %3492 = vmatmul.mubr.msk.f32.gmra.mrb[36].mxu1 %vm1128_vm7, %v1025_v18 }
 0x403   : > { %3494 = vmatprep.mubr.msk.f32.mxu1 %vm4221_vm6, %v4222_v24 }
 0x406   : > { %3495 = vmatmul.mubr.msk.f32.gmra.mrb[38].mxu1 %vm1128_vm7, %v4687_v5 }
 0x407   : > { %3507 = vmatprep.mubr.msk.f32.mxu1 %vm4221_vm6, %v4222_v24 }
 0x48d   : > { %v4747_v32 = vpop.f32.mrb[0].mxu1 }
 0x48e   : > { %v3409_v34 = vpop.f32.mrb[1].mxu1  ;;  %v1570_v35 = vsel %vm1569_vm9, %v4747_v32, -inf }
 0x48f   : > { %1571 = vmax.xlane.f32.xlu1 %v1570_v35 }
 0x491   : > { %v4751_v36 = vpop.f32.mrb[2].mxu1 }
 0x492   : > { %v3412_v37 = vpop.f32.mrb[3].mxu1  ;;  %v1573_v38 = vsel %vm1569_vm9, %v4751_v36, -inf }
 0x493   : > { %1574 = vmax.xlane.f32.xlu0 %v1573_v38  ;;  %v1092_v38 = vpop.permute.xlu0 %1091 }
 0x495   : > { %v4755_v39 = vpop.f32.mrb[4].mxu1 }
 0x496   : > { %v3415_v40 = vpop.f32.mrb[5].mxu1  ;;  %v1576_v6 = vsel %vm1569_vm9, %v4755_v39, -inf }
 0x499   : > { %v4757_v41 = vpop.f32.mrb[6].mxu1 }
 0x49a   : > { %v3418_v42 = vpop.f32.mrb[7].mxu1  ;;  %v1579_v9 = vsel %vm1569_vm9, %v4757_v41, -inf }
 0x49d   : > { %v4759_v43 = vpop.f32.mrb[8].mxu1 }
 0x49e   : > { %v3421_v44 = vpop.f32.mrb[9].mxu1  ;;  %v1582_v14 = vsel %vm1569_vm9, %v4759_v43, -inf }
 0x4a0   : > { %3981 = vrot.lane.b32.xlu1 %v4597_v19, %s4230_s27  ;;  %s5376_s27 = sld [smem:[#allocation20_spill]] (!%p3183_p1) }
 0x4a1   : > { %v4763_v47 = vpop.f32.mrb[10].mxu1 }
 0x4a2   : > { %v3434_v48 = vpop.f32.mrb[11].mxu1  ;;  %v1585_v49 = vsel %vm1569_vm9, %v4763_v47, -inf }
 0x4a3   : > { %1586 = vmax.xlane.f32.xlu0 %v1585_v49 }
 0x4a5   : > { %v4767_v50 = vpop.f32.mrb[12].mxu1 }
 0x4a6   : > { %v3437_v51 = vpop.f32.mrb[13].mxu1  ;;  %v1588_v52 = vsel %vm1569_vm9, %v4767_v50, -inf }
 0x4a7   : > { %1589 = vmax.xlane.f32.xlu0 %v1588_v52 }
 0x4a9   : > { %v4771_v53 = vpop.f32.mrb[14].mxu1 }
 0x4aa   : > { %v3440_v54 = vpop.f32.mrb[15].mxu1  ;;  %v1591_v55 = vsel %vm1569_vm9, %v4771_v53, -inf }
 0x4ab   : > { %1592 = vmax.xlane.f32.xlu0 %v1591_v55 }
 0x4ad   : > { %v4775_v56 = vpop.f32.mrb[16].mxu1 }
 0x4ae   : > { %v3443_v57 = vpop.f32.mrb[17].mxu1  ;;  %v1594_v58 = vsel %vm1569_vm9, %v4775_v56, -inf }
 0x4af   : > { %1595 = vmax.xlane.f32.xlu0 %v1594_v58 }
 0x4b1   : > { %v4779_v59 = vpop.f32.mrb[18].mxu1 }
 0x4b2   : > { %v3446_v60 = vpop.f32.mrb[19].mxu1  ;;  %v1597_v61 = vsel %vm1569_vm9, %v4779_v59, -inf }
 0x4b3   : > { %1598 = vmax.xlane.f32.xlu0 %v1597_v61 }
 0x4b5   : > { %v4783_v63 = vpop.f32.mrb[20].mxu1 }
 0x4b6   : > { %v3459_v0 = vpop.f32.mrb[21].mxu1  ;;  %v1600_v18 = vsel %vm1569_vm9, %v4783_v63, -inf }
 0x4b9   : > { %v4785_v62 = vpop.f32.mrb[22].mxu1 }
 0x4ba   : > { %v3462_v1 = vpop.f32.mrb[23].mxu1  ;;  %v1603_v25 = vsel %vm1569_vm9, %v4785_v62, -inf }
 0x4bd   : > { %v4787_v2 = vpop.f32.mrb[24].mxu1 }
 0x4be   : > { %v3465_v3 = vpop.f32.mrb[25].mxu1  ;;  %v1606_v29 = vsel %vm1569_vm9, %v4787_v2, -inf }
 0x4c1   : > { %v4789_v4 = vpop.f32.mrb[26].mxu1 }
 0x4c2   : > { %v3468_v5 = vpop.f32.mrb[27].mxu1  ;;  %v1609_v35 = vsel %vm1569_vm9, %v4789_v4, -inf }
 0x4c4   : > { %1577 = vmax.xlane.f32.xlu1 %v1576_v6 }
 0x4c5   : > { %v4793_v7 = vpop.f32.mrb[28].mxu1 }
 0x4c6   : > { %v3471_v8 = vpop.f32.mrb[29].mxu1  ;;  %v1612_v37 = vsel %vm1569_vm9, %v4793_v7, -inf }
 0x4c8   : > { %1580 = vmax.xlane.f32.xlu1 %v1579_v9 }
 0x4c9   : > { %v4797_v10 = vpop.f32.mrb[30].mxu1 }
 0x4ca   : > { %v3484_v11 = vpop.f32.mrb[31].mxu1  ;;  %v1615_v13 = vsel %vm1569_vm9, %v4797_v10, -inf }
 0x4cb   : > { %1616 = vmax.xlane.f32.xlu0 %v1615_v13 }
 0x4cc   : > { %1583 = vmax.xlane.f32.xlu1 %v1582_v14 }
 0x4cd   : > { %v4803_v15 = vpop.f32.mrb[32].mxu1 }
 0x4ce   : > { %v3487_v16 = vpop.f32.mrb[33].mxu1  ;;  %v1618_v17 = vsel %vm1569_vm9, %v4803_v15, -inf }
 0x4cf   : > { %1619 = vmax.xlane.f32.xlu0 %v1618_v17 }
 0x4d0   : > { %1601 = vmax.xlane.f32.xlu1 %v1600_v18 }
 0x4d1   : > { %v4809_v20 = vpop.f32.mrb[34].mxu1 }
 0x4d2   : > { %v3490_v21 = vpop.f32.mrb[35].mxu1  ;;  %v1621_v23 = vsel %vm1569_vm9, %v4809_v20, -inf }
 0x4d3   : > { %1622 = vmax.xlane.f32.xlu0 %v1621_v23 }
 0x4d4   : > { %1604 = vmax.xlane.f32.xlu1 %v1603_v25 }
 0x4d5   : > { %v4815_v26 = vpop.f32.mrb[36].mxu1 }
 0x4d6   : > { %v3493_v27 = vpop.f32.mrb[37].mxu1  ;;  %v1624_v28 = vsel %vm1569_vm9, %v4815_v26, -inf }
 0x4d7   : > { %1625 = vmax.xlane.f32.xlu0 %v1624_v28 }
 0x4d8   : > { %1607 = vmax.xlane.f32.xlu1 %v1606_v29 }
 0x4d9   : > { %v4821_v30 = vpop.f32.mrb[38].mxu1 }
 0x4da   : > { %v3496_v31 = vpop.f32.mrb[39].mxu1  ;;  %v1627_v34 = vsel %vm1569_vm9, %v4821_v30, -inf }
 0x4db   : > { %1628 = vmax.xlane.f32.xlu0 %v1627_v34 }
 0x4dc   : > { %1610 = vmax.xlane.f32.xlu1 %v1609_v35 }
 0x4e0   : > { %1613 = vmax.xlane.f32.xlu1 %v1612_v37 }
 0x4f1   : > { %3991 = vrot.lane.b32.xlu0 %v4588_v12, %s4232_s14 }
 0x51c   : > { %v1572_v40 = vpop.xlane.xlu1 %1571 }
 0x51d   : > { %v1630_v42 = vsub.f32 %v4747_v32, %v1572_v40 }
 0x51f   : > { %v1650_v44 = vmul.f32 1.442695, %v1630_v42 }
 0x520   : > { %v3982_v48 = vpop.permute.xlu1 %3981  ;;  %v1575_v49 = vpop.xlane.xlu0 %1574 }
 0x521   : > { %4015 = vpow2.f32 %v1650_v44  ;;  %v3984_v51 = vunpack.i.h.bf16 %v3982_v48  ;;  %v3983_v52 = vunpack.i.l.bf16 %v3982_v48  ;;  %v1631_v54 = vsub.f32 %v4751_v36, %v1575_v49 }
 0x523   : > { %v3764_v55 = vpack.c.bf16 %v3984_v51, %v3983_v52  ;;  %v1652_v57 = vmul.f32 1.442695, %v1631_v54 }
 0x525   : > { %4017 = vpow2.f32 %v1652_v57  ;;  %3765 = vmatpush3.bf16.msra.mxu0 %v3764_v55 }
 0x526   : > { %3530 = vmatprep.subr.mxu0 %v4222_v24 }
 0x529   : > { %3531 = vmatpush3.msra.mxu0 %v1092_v38 }
 0x52a   : > { %3772 = vmatprep.subr.bf16.mxu0 %v4220_v46 }
 0x52b   : > { %v4835_v58 = vpop.eup %4015 }
 0x52c   : > { %v1690_v32 = vsel %vm1569_vm9, %v4835_v58, 0.0 }
 0x52d   : > { %1691 = vadd.xlane.f32.xlu1 %v1690_v32 }
 0x52f   : > { %v4839_v60 = vpop.eup %4017 }
 0x530   : > { %v1693_v36 = vsel %vm1569_vm9, %v4839_v60, 0.0  ;;  %v1587_v61 = vpop.xlane.xlu0 %1586 }
 0x531   : > { %1694 = vadd.xlane.f32.xlu1 %v1693_v36  ;;  %v1635_v9 = vsub.f32 %v4763_v47, %v1587_v61 }
 0x533   : > { %v1660_v17 = vmul.f32 1.442695, %v1635_v9 }
 0x534   : > { %v1590_v5 = vpop.xlane.xlu0 %1589 }
 0x535   : > { %v1636_v18 = vsub.f32 %v4767_v50, %v1590_v5 }
 0x537   : > { %v1662_v25 = vmul.f32 1.442695, %v1636_v18 }
 0x538   : > { %v1593_v16 = vpop.xlane.xlu0 %1592 }
 0x53c   : > { %v1596_v27 = vpop.xlane.xlu0 %1595 }
 0x53d   : > { %v1638_v50 = vsub.f32 %v4775_v56, %v1596_v27 }
 0x540   : > { %v1599_v52 = vpop.xlane.xlu0 %1598 }
 0x551   : > { %v1578_v0 = vpop.xlane.xlu1 %1577 }
 0x552   : > { %v1632_v1 = vsub.f32 %v4755_v39, %v1578_v0 }
 0x554   : > { %v1654_v3 = vmul.f32 1.442695, %v1632_v1 }
 0x555   : > { %v1581_v6 = vpop.xlane.xlu1 %1580 }
 0x556   : > { %4019 = vpow2.f32 %v1654_v3  ;;  %v1633_v8 = vsub.f32 %v4757_v41, %v1581_v6  ;;  %v1637_v41 = vsub.f32 %v4771_v53, %v1593_v16  ;;  %v1666_v53 = vmul.f32 1.442695, %v1638_v50 }
 0x558   : > { %v1656_v11 = vmul.f32 1.442695, %v1633_v8  ;;  %v1664_v29 = vmul.f32 1.442695, %v1637_v41  ;;  %v1617_v36 = vpop.xlane.xlu0 %1616 }
 0x559   : > { %v1584_v13 = vpop.xlane.xlu1 %1583 }
 0x55a   : > { %4021 = vpow2.f32 %v1656_v11  ;;  %v1634_v14 = vsub.f32 %v4759_v43, %v1584_v13  ;;  %v1639_v11 = vsub.f32 %v4779_v59, %v1599_v52 }
 0x55c   : > { %v1658_v21 = vmul.f32 1.442695, %v1634_v14  ;;  %v1620_v9 = vpop.xlane.xlu0 %1619  ;;  %v1668_v16 = vmul.f32 1.442695, %v1639_v11 }
 0x55d   : > { %v1602_v23 = vpop.xlane.xlu1 %1601 }
 0x55e   : > { %4023 = vpow2.f32 %v1658_v21  ;;  %v1640_v37 = vsub.f32 %v4783_v63, %v1602_v23 }
 0x55f   : > { %4025 = vpow2.f32 %v1660_v17 }
 0x560   : > { %v4848_v39 = vpop.eup %4019  ;;  %4027 = vpow2.f32 %v1662_v25  ;;  %v1670_v56 = vmul.f32 1.442695, %v1640_v37  ;;  %v1623_v23 = vpop.xlane.xlu0 %1622  ;;  %v1646_v25 = vsub.f32 %v4803_v15, %v1620_v9 }
 0x561   : > { %v1605_v47 = vpop.xlane.xlu1 %1604  ;;  %v1696_v28 = vsel %vm1569_vm9, %v4848_v39, 0.0  ;;  %4029 = vpow2.f32 %v1664_v29 }
 0x562   : > { %1697 = vadd.xlane.f32.xlu1 %v1696_v28  ;;  %4031 = vpow2.f32 %v1666_v53  ;;  %v1641_v44 = vsub.f32 %v4785_v62, %v1605_v47  ;;  %v1682_v47 = vmul.f32 1.442695, %v1646_v25  ;;  %v1647_v28 = vsub.f32 %v4809_v20, %v1623_v23 }
 0x563   : > { %4033 = vpow2.f32 %v1670_v56 }
 0x564   : > { %v4853_v43 = vpop.eup %4021  ;;  %v1672_v51 = vmul.f32 1.442695, %v1641_v44  ;;  %v1626_v27 = vpop.xlane.xlu0 %1625 }
 0x565   : > { %v1608_v31 = vpop.xlane.xlu1 %1607  ;;  %v1699_v34 = vsel %vm1569_vm9, %v4853_v43, 0.0  ;;  %v1648_v29 = vsub.f32 %v4815_v26, %v1626_v27 }
 0x566   : > { %1700 = vadd.xlane.f32.xlu1 %v1699_v34  ;;  %v1642_v63 = vsub.f32 %v4787_v2, %v1608_v31  ;;  %4035 = vpow2.f32 %v1672_v51  ;;  %v1645_v2 = vsub.f32 %v4797_v10, %v1617_v36 }
 0x567   : > { %v1686_v34 = vmul.f32 1.442695, %v1648_v29 }
 0x568   : > { %v4858_v35 = vpop.eup %4023  ;;  %v1674_v62 = vmul.f32 1.442695, %v1642_v63  ;;  %v1629_v50 = vpop.xlane.xlu0 %1628 }
 0x569   : > { %v1702_v38 = vsel %vm1569_vm9, %v4858_v35, 0.0  ;;  %v4863_v40 = vpop.eup %4025  ;;  %v1611_v42 = vpop.xlane.xlu1 %1610  ;;  %v1649_v15 = vsub.f32 %v4821_v30, %v1629_v50 }
 0x56a   : > { %1703 = vadd.xlane.f32.xlu0 %v1702_v38  ;;  %v1705_v48 = vsel %vm1569_vm9, %v4863_v40, 0.0  ;;  %v4868_v49 = vpop.eup %4027  ;;  %4037 = vpow2.f32 %v1674_v62  ;;  %v1643_v17 = vsub.f32 %v4789_v4, %v1611_v42  ;;  %v1684_v4 = vmul.f32 1.442695, %v1647_v28 }
 0x56b   : > { %v1708_v55 = vsel %vm1569_vm9, %v4868_v49, 0.0  ;;  %v4873_v57 = vpop.eup %4029  ;;  %v1688_v20 = vmul.f32 1.442695, %v1649_v15 }
 0x56c   : > { %v1711_v61 = vsel %vm1569_vm9, %v4873_v57, 0.0  ;;  %v4878_v0 = vpop.eup %4031  ;;  %v1676_v59 = vmul.f32 1.442695, %v1643_v17  ;;  %v3992_v36 = vpop.permute.xlu0 %3991 }
 0x56d   : > { %v1614_v54 = vpop.xlane.xlu1 %1613  ;;  %v1714_v3 = vsel %vm1569_vm9, %v4878_v0, 0.0  ;;  %v4885_v5 = vpop.eup %4033  ;;  %v3993_v23 = vunpack.i.l.bf16 %v3992_v36 }
 0x56e   : > { %1706 = vadd.xlane.f32.xlu0 %v1705_v48  ;;  %v1644_v32 = vsub.f32 %v4793_v7, %v1614_v54  ;;  %v1680_v7 = vmul.f32 1.442695, %v1645_v2  ;;  %v1720_v6 = vsel %vm1569_vm9, %v4885_v5, 0.0 }
 0x570   : > { %v1678_v1 = vmul.f32 1.442695, %v1644_v32  ;;  %v4889_v8 = vpop.eup %4035 }
 0x572   : > { %1709 = vadd.xlane.f32.xlu0 %v1708_v55  ;;  %4039 = vpow2.f32 %v1678_v1 }
 0x573   : > { %4041 = vpow2.f32 %v1680_v7 }
 0x574   : > { %v4893_v10 = vpop.eup %4037  ;;  %4043 = vpow2.f32 %v1668_v16 }
 0x575   : > { %v1726_v13 = vsel %vm1569_vm9, %v4893_v10, 0.0  ;;  %4045 = vpow2.f32 %v1676_v59 }
 0x576   : > { %1712 = vadd.xlane.f32.xlu0 %v1711_v61  ;;  %4047 = vpow2.f32 %v1682_v47 }
 0x577   : > { %3986 = vrot.lane.b32.xlu1 %v4588_v12, %s4233_s0  ;;  %v1723_v12 = vsel %vm1569_vm9, %v4889_v8, 0.0  ;;  %4049 = vpow2.f32 %v1684_v4 }
 0x578   : > { %4051 = vpow2.f32 %v1686_v34 }
 0x579   : > { %4053 = vpow2.f32 %v1688_v20 }
 0x57a   : > { %1715 = vadd.xlane.f32.xlu0 %v1714_v3 }
 0x57c   : > { %v4898_v14 = vpop.eup %4039 }
 0x57d   : > { %v1732_v18 = vsel %vm1569_vm9, %v4898_v14, 0.0  ;;  %v4903_v21 = vpop.eup %4041 }
 0x57e   : > { %1721 = vadd.xlane.f32.xlu0 %v1720_v6  ;;  %v1735_v41 = vsel %vm1569_vm9, %v4903_v21, 0.0  ;;  %v4910_v31 = vpop.eup %4043 }
 0x57f   : > { %v1717_v53 = vsel %vm1569_vm9, %v4910_v31, 0.0  ;;  %v4915_v37 = vpop.eup %4045 }
 0x580   : > { %v1729_v38 = vsel %vm1569_vm9, %v4915_v37, 0.0  ;;  %v4919_v42 = vpop.eup %4047 }
 0x581   : > { %v1738_v26 = vsel %vm1569_vm9, %v4919_v42, 0.0  ;;  %v4923_v56 = vpop.eup %4049 }
 0x582   : > { %1724 = vadd.xlane.f32.xlu0 %v1723_v12  ;;  %v1741_v30 = vsel %vm1569_vm9, %v4923_v56, 0.0  ;;  %v4929_v44 = vpop.eup %4051 }
 0x583   : > { %v1744_v48 = vsel %vm1569_vm9, %v4929_v44, 0.0  ;;  %v4935_v51 = vpop.eup %4053 }
 0x584   : > { %v1747_v63 = vsel %vm1569_vm9, %v4935_v51, 0.0 }
 0x586   : > { %1727 = vadd.xlane.f32.xlu0 %v1726_v13 }
 0x58a   : > { %1733 = vadd.xlane.f32.xlu0 %v1732_v18  ;;  %v3994_v18 = vunpack.i.h.bf16 %v3992_v36 }
 0x58e   : > { %1736 = vadd.xlane.f32.xlu0 %v1735_v41  ;;  %v3773_v41 = vpack.c.bf16 %v3994_v18, %v3993_v23 }
 0x59b   : > { %1718 = vadd.xlane.f32.xlu1 %v1717_v53 }
 0x59f   : > { %1730 = vadd.xlane.f32.xlu1 %v1729_v38 }
 0x5a3   : > { %1739 = vadd.xlane.f32.xlu1 %v1738_v26 }
 0x5a4   : > { %3996 = vrot.lane.b32.xlu0 %v4597_v19, %s4233_s0 }
 0x5a7   : > { %1742 = vadd.xlane.f32.xlu1 %v1741_v30 }
 0x5a8   : > { %4001 = vrot.lane.b32.xlu0 %v4597_v19, %s4232_s14 }
 0x5ab   : > { %1745 = vadd.xlane.f32.xlu1 %v1744_v48 }
 0x5ac   : > { %1106 = vrot.lane.b32.xlu0 %v4601_v22, %s4233_s0  ;;  %s5377_s0 = smov (!%p3183_p1), %s5376_s27 }
 0x5af   : > { %1748 = vadd.xlane.f32.xlu1 %v1747_v63 }
 0x5b0   : > { %1121 = vrot.lane.b32.xlu0 %v4601_v22, %s4232_s14 }
 0x5ba   : > { %v1692_v52 = vpop.xlane.xlu1 %1691 }
 0x5bb   : > { %4055 = vrcp.f32 %v1692_v52 }
 0x5be   : > { %v1695_v54 = vpop.xlane.xlu1 %1694 }
 0x5bf   : > { %4057 = vrcp.f32 %v1695_v54 }
 0x5c5   : > { %v4056_v19 = vpop.eup %4055 }
 0x5c6   : > { %v1790_v55 = vmul.f32 %v4056_v19, %v4835_v58 }
 0x5c8   : > { %3508 = vmatmul.mubr.msk.f32.vlgmr.msra.gmra.mrb[40].mxu1 %vm1569_vm9, %v1790_v55 }
 0x5c9   : > { %v4058_v62 = vpop.eup %4057  ;;  %3510 = vmatprep.mubr.msk.f32.mxu1 %vm4221_vm6, %v4222_v24 }
 0x5ca   : > { %v1791_v32 = vmul.f32 %v4058_v62, %v4839_v60 }
 0x5cc   : > { %3511 = vmatmul.mubr.msk.f32.gmra.mrb[42].mxu1 %vm1569_vm9, %v1791_v32 }
 0x5cd   : > { %3513 = vmatprep.mubr.msk.f32.mxu1 %vm4221_vm6, %v4222_v24 }
 0x5ef   : > { %v1698_v22 = vpop.xlane.xlu1 %1697 }
 0x5f0   : > { %4059 = vrcp.f32 %v1698_v22 }
 0x5f3   : > { %v1701_v61 = vpop.xlane.xlu1 %1700 }
 0x5f4   : > { %4061 = vrcp.f32 %v1701_v61 }
 0x5f7   : > { %v3987_v2 = vpop.permute.xlu1 %3986  ;;  %v1704_v58 = vpop.xlane.xlu0 %1703 }
 0x5f8   : > { %v3989_v1 = vunpack.i.h.bf16 %v3987_v2  ;;  %v3988_v3 = vunpack.i.l.bf16 %v3987_v2  ;;  %4063 = vrcp.f32 %v1704_v58 }
 0x5fa   : > { %v4060_v7 = vpop.eup %4059  ;;  %v3767_v6 = vpack.c.bf16 %v3989_v1, %v3988_v3 }
 0x5fb   : > { %v1707_v12 = vpop.xlane.xlu0 %1706  ;;  %v1792_v60 = vmul.f32 %v4060_v7, %v4848_v39 }
 0x5fc   : > { %4065 = vrcp.f32 %v1707_v12  ;;  %3768 = vmatpush3.bf16.msra.mxu1 %v3767_v6 }
 0x5fd   : > { %3514 = vmatmul.mubr.msk.f32.gmra.mrb[44].mxu1 %vm1569_vm9, %v1792_v60  ;;  %3769 = vmatprep.subr.bf16.mxu1 %v4220_v46 }
 0x5fe   : > { %v4062_v9 = vpop.eup %4061  ;;  %3516 = vmatprep.mubr.msk.f32.mxu1 %vm4221_vm6, %v4222_v24 }
 0x5ff   : > { %v1710_v11 = vpop.xlane.xlu0 %1709  ;;  %v1793_v13 = vmul.f32 %v4062_v9, %v4853_v43 }
 0x600   : > { %4067 = vrcp.f32 %v1710_v11 }
 0x601   : > { %3517 = vmatmul.mubr.msk.f32.gmra.mrb[46].mxu1 %vm1569_vm9, %v1793_v13 }
 0x602   : > { %v4064_v16 = vpop.eup %4063  ;;  %3519 = vmatprep.mubr.msk.f32.mxu1 %vm4221_vm6, %v4222_v24 }
 0x603   : > { %v1713_v39 = vpop.xlane.xlu0 %1712  ;;  %v1794_v17 = vmul.f32 %v4064_v16, %v4858_v35 }
 0x604   : > { %4069 = vrcp.f32 %v1713_v39 }
 0x605   : > { %3520 = vmatmul.mubr.msk.f32.gmra.mrb[48].mxu1 %vm1569_vm9, %v1794_v17 }
 0x606   : > { %v4066_v25 = vpop.eup %4065  ;;  %3557 = vmatprep.mubr.msk.f32.mxu1 %vm4221_vm6, %v4222_v24 }
 0x607   : > { %v1795_v43 = vmul.f32 %v4066_v25, %v4863_v40  ;;  %v1716_v59 = vpop.xlane.xlu0 %1715 }
 0x608   : > { %4071 = vrcp.f32 %v1716_v59 }
 0x609   : > { %3533 = vmatmul.mubr.msk.f32.vlgmr.msra.gmra.mrb[10].mxu0 %vm1569_vm9, %v1795_v43 }
 0x60a   : > { %v4068_v27 = vpop.eup %4067  ;;  %3774 = vmatpush3.bf16.msra.mxu0 %v3773_v41  ;;  %3535 = vmatprep.mubr.msk.f32.mxu0 %vm4221_vm6, %v4222_v24 }
 0x60b   : > { %v1722_v35 = vpop.xlane.xlu0 %1721  ;;  %v1796_v47 = vmul.f32 %v4068_v27, %v4868_v49  ;;  %3775 = vmatprep.subr.bf16.mxu0 %v4220_v46 }
 0x60c   : > { %4073 = vrcp.f32 %v1722_v35 }
 0x60d   : > { %3536 = vmatmul.mubr.msk.f32.gmra.mrb[12].mxu0 %vm1569_vm9, %v1796_v47 }
 0x60e   : > { %v4070_v28 = vpop.eup %4069  ;;  %3538 = vmatprep.mubr.msk.f32.mxu0 %vm4221_vm6, %v4222_v24 }
 0x60f   : > { %v1725_v40 = vpop.xlane.xlu0 %1724  ;;  %v1797_v4 = vmul.f32 %v4070_v28, %v4873_v57 }
 0x610   : > { %4075 = vrcp.f32 %v1725_v40 }
 0x611   : > { %3539 = vmatmul.mubr.msk.f32.gmra.mrb[14].mxu0 %vm1569_vm9, %v1797_v4 }
 0x612   : > { %v4072_v29 = vpop.eup %4071  ;;  %3541 = vmatprep.mubr.msk.f32.mxu0 %vm4221_vm6, %v4222_v24 }
 0x613   : > { %v1728_v50 = vpop.xlane.xlu0 %1727  ;;  %v1798_v49 = vmul.f32 %v4072_v29, %v4878_v0 }
 0x614   : > { %4077 = vrcp.f32 %v1728_v50  ;;  %v735_v50 = vld [vmem:[%s4403_s17] sm:$0xff] }
 0x615   : > { %3542 = vmatmul.mubr.msk.f32.gmra.mrb[16].mxu0 %vm1569_vm9, %v1798_v49  ;;  %v736_v49 = vld [vmem:[%s4403_s17 + $0x8] sm:$0xff] }
 0x616   : > { %3544 = vmatprep.mubr.msk.f32.mxu0 %vm4221_vm6, %v4222_v24  ;;  %v4074_v30 = vpop.eup %4073 }
 0x617   : > { %v1734_v34 = vpop.xlane.xlu0 %1733  ;;  %v1800_v52 = vmul.f32 %v4074_v30, %v4885_v5 }
 0x61a   : > { %v4076_v19 = vpop.eup %4075 }
 0x61b   : > { %v1737_v15 = vpop.xlane.xlu0 %1736  ;;  %v1801_v32 = vmul.f32 %v4076_v19, %v4889_v8 }
 0x61e   : > { %v4078_v5 = vpop.eup %4077 }
 0x61f   : > { %v3997_v53 = vpop.permute.xlu0 %3996  ;;  %v1802_v36 = vmul.f32 %v4078_v5, %v4893_v10 }
 0x620   : > { %v3999_v57 = vunpack.i.h.bf16 %v3997_v53  ;;  %v3998_v20 = vunpack.i.l.bf16 %v3997_v53  ;;  %v738_v53 = vld [vmem:[%s4403_s17 + $0x18] sm:$0xff] }
 0x622   : > { %v3770_v38 = vpack.c.bf16 %v3999_v57, %v3998_v20 }
 0x623   : > { %v4002_v26 = vpop.permute.xlu0 %4001 }
 0x624   : > { %v4004_v48 = vunpack.i.h.bf16 %v4002_v26  ;;  %v4003_v63 = vunpack.i.l.bf16 %v4002_v26  ;;  %3771 = vmatpush3.bf16.msra.mxu1 %v3770_v38 }
 0x625   : > { %3555 = vmatprep.subr.mxu1 %v4222_v24 }
 0x626   : > { %v3776_v0 = vpack.c.bf16 %v4004_v48, %v4003_v63 }
 0x627   : > { %v1107_v54 = vpop.permute.xlu0 %1106 }
 0x628   : > { %v1719_v55 = vpop.xlane.xlu1 %1718  ;;  %3556 = vmatpush3.msra.mxu1 %v1107_v54  ;;  %3777 = vmatpush3.bf16.msra.mxu0 %v3776_v0 }
 0x629   : > { %4079 = vrcp.f32 %v1719_v55  ;;  %3558 = vmatmul.mubr.msk.f32.vlgmr.msra.gmra.mrb[50].mxu1 %vm1569_vm9, %v1800_v52  ;;  %3580 = vmatprep.subr.mxu0 %v4222_v24 }
 0x62a   : > { %3560 = vmatprep.mubr.msk.f32.mxu1 %vm4221_vm6, %v4222_v24  ;;  %3778 = vmatprep.subr.bf16.mxu1 %v4220_v46  ;;  %4081 = vrcp.f32 %v1737_v15  ;;  %v737_v15 = vld [vmem:[%s4403_s17 + $0x10] sm:$0xff]  ;;  %s4236_s17 = smov 24  }
 0x62b   : > { %v1122_v62 = vpop.permute.xlu0 %1121  ;;  %v3783_v57 = vpack.c.bf16 %v738_v53, %v737_v15  ;;  %v4116_v15 = vld [vmem:[#allocation2] sm:$0xff] }
 0x62c   : > { %v1731_v22 = vpop.xlane.xlu1 %1730  ;;  %3581 = vmatpush3.msra.mxu0 %v1122_v62 }
 0x62d   : > { %4083 = vrcp.f32 %v1731_v22  ;;  %3561 = vmatmul.mubr.msk.f32.gmra.mrb[52].mxu1 %vm1569_vm9, %v1801_v32  ;;  %3786 = vmatprep.subr.bf16.mxu0 %v4220_v46 }
 0x62e   : > { %3563 = vmatprep.mubr.msk.f32.mxu1 %vm4221_vm6, %v4222_v24  ;;  %4085 = vrcp.f32 %v1734_v34  ;;  %v3779_v34 = vpack.c.bf16 %v736_v49, %v735_v50  ;;  %v5096_v50 = vld [vmem:[%s4413_s16] sm:$0x3f] }
 0x630   : > { %v1740_v61 = vpop.xlane.xlu1 %1739  ;;  %3781 = vmatpush3.bf16.xpose.msk.msra.mxu1 %vm4489_vm5, %v3779_v34 }
 0x631   : > { %4087 = vrcp.f32 %v1740_v61  ;;  %3564 = vmatmul.mubr.msk.f32.gmra.mrb[54].mxu1 %vm1569_vm9, %v1802_v36  ;;  %3782 = vmatprep.subr.bf16.mxu1 %v4220_v46 }
 0x632   : > { %3566 = vmatprep.mubr.msk.f32.mxu1 %vm4221_vm6, %v4222_v24 }
 0x633   : > { %v4080_v8 = vpop.eup %4079 }
 0x634   : > { %v1743_v2 = vpop.xlane.xlu1 %1742  ;;  %v1799_v58 = vmul.f32 %v4080_v8, %v4910_v31  ;;  %v4082_v1 = vpop.eup %4081 }
 0x635   : > { %4089 = vrcp.f32 %v1743_v2  ;;  %v1805_v10 = vmul.f32 %v4082_v1, %v4903_v21 }
 0x636   : > { %3545 = vmatmul.mubr.msk.f32.gmra.mrb[18].mxu0 %vm1569_vm9, %v1799_v58 }
 0x637   : > { %v4084_v3 = vpop.eup %4083  ;;  %3582 = vmatprep.mubr.msk.f32.mxu0 %vm4221_vm6, %v4222_v24 }
 0x638   : > { %v1746_v7 = vpop.xlane.xlu1 %1745  ;;  %v1803_v6 = vmul.f32 %v4084_v3, %v4915_v37  ;;  %v4086_v12 = vpop.eup %4085  ;;  %3785 = vmatpush3.bf16.xpose.msk.msra.mxu1 %vm4489_vm5, %v3783_v57 }
 0x639   : > { %4091 = vrcp.f32 %v1746_v7  ;;  %v1804_v9 = vmul.f32 %v4086_v12, %v4898_v14  ;;  %3828 = vmatprep.subr.bf16.mxu1 %v4220_v46 }
 0x63a   : > { %3567 = vmatmul.mubr.msk.f32.gmra.mrb[56].mxu1 %vm1569_vm9, %v1803_v6  ;;  %3583 = vmatmul.mubr.msk.f32.vlgmr.msra.gmra.mrb[20].mxu0 %vm1569_vm9, %v1805_v10 }
 0x63b   : > { %v4088_v31 = vpop.eup %4087  ;;  %3569 = vmatprep.mubr.msk.f32.mxu1 %vm4221_vm6, %v4222_v24  ;;  %3585 = vmatprep.mubr.msk.f32.mxu0 %vm4221_vm6, %v4222_v24 }
 0x63c   : > { %v1749_v60 = vpop.xlane.xlu1 %1748  ;;  %v1806_v21 = vmul.f32 %v4088_v31, %v4919_v42 }
 0x63d   : > { %4093 = vrcp.f32 %v1749_v60 }
 0x63e   : > { %3570 = vmatmul.mubr.msk.f32.gmra.mrb[58].mxu1 %vm1569_vm9, %v1804_v9  ;;  %3586 = vmatmul.mubr.msk.f32.gmra.mrb[22].mxu0 %vm1569_vm9, %v1806_v21 }
 0x63f   : > { %v4090_v37 = vpop.eup %4089  ;;  %3588 = vmatprep.mubr.msk.f32.mxu0 %vm4221_vm6, %v4222_v24  ;;  %3605 = vmatprep.mubr.msk.f32.mxu1 %vm4221_vm6, %v4222_v24 }
 0x640   : > { %v1807_v11 = vmul.f32 %v4090_v37, %v4923_v56 }
 0x642   : > { %3589 = vmatmul.mubr.msk.f32.gmra.mrb[24].mxu0 %vm1569_vm9, %v1807_v11 }
 0x643   : > { %v4092_v13 = vpop.eup %4091  ;;  %3591 = vmatprep.mubr.msk.f32.mxu0 %vm4221_vm6, %v4222_v24 }
 0x644   : > { %v1808_v14 = vmul.f32 %v4092_v13, %v4929_v44 }
 0x646   : > { %3592 = vmatmul.mubr.msk.f32.gmra.mrb[26].mxu0 %vm1569_vm9, %v1808_v14 }
 0x647   : > { %v4094_v42 = vpop.eup %4093  ;;  %3594 = vmatprep.mubr.msk.f32.mxu0 %vm4221_vm6, %v4222_v24 }
 0x648   : > { %v1809_v16 = vmul.f32 %v4094_v42, %v4935_v51 }
 0x64a   : > { %3595 = vmatmul.mubr.msk.f32.gmra.mrb[28].mxu0 %vm1569_vm9, %v1809_v16 }
 0x64b   : > { %3652 = vmatprep.mubr.msk.f32.mxu0 %vm4221_vm6, %v4222_v24 }
 0x69b   : > { %v5029_v56 = vpop.f32.mrb[40].mxu1 }
 0x69c   : > { %v3509_v39 = vpop.f32.mrb[41].mxu1 }
 0x69f   : > { %v5031_v17 = vpop.f32.mrb[42].mxu1 }
 0x6a0   : > { %v3512_v18 = vpop.f32.mrb[43].mxu1 }
 0x6d0   : > { %v5033_v44 = vpop.f32.mrb[44].mxu1 }
 0x6d1   : > { %v3515_v23 = vpop.f32.mrb[45].mxu1 }
 0x6d4   : > { %v5035_v25 = vpop.f32.mrb[46].mxu1 }
 0x6d5   : > { %v3518_v43 = vpop.f32.mrb[47].mxu1 }
 0x6d8   : > { %v5037_v51 = vpop.f32.mrb[48].mxu1 }
 0x6d9   : > { %v3521_v59 = vpop.f32.mrb[49].mxu1 }
 0x6dc   : > { %v1996_v41 = vpop.f32.mrb[10].mxu0 }
 0x6dd   : > { %2235 = vrot.lane.b32.xlu1 %v1996_v41, %s4234_s13  ;;  %v3534_v27 = vpop.f32.mrb[11].mxu0 }
 0x6e0   : > { %v2001_v35 = vpop.f32.mrb[12].mxu0 }
 0x6e1   : > { %2237 = vrot.lane.b32.xlu0 %v2001_v35, %s4234_s13  ;;  %v3537_v47 = vpop.f32.mrb[13].mxu0 }
 0x6e4   : > { %v2006_v28 = vpop.f32.mrb[14].mxu0 }
 0x6e5   : > { %2239 = vrot.lane.b32.xlu1 %v2006_v28, %s4234_s13  ;;  %v3540_v40 = vpop.f32.mrb[15].mxu0 }
 0x6e8   : > { %v2011_v4 = vpop.f32.mrb[16].mxu0 }
 0x6e9   : > { %v3543_v29 = vpop.f32.mrb[17].mxu0 }
 0x6ea   : > { %v2431_v29 = vsub.s32 2, %v4552_v33 }
 0x6ec   : > { %v2432_v49 = vrot.slane %v5096_v50, %v2431_v29 }
 0x6fc   : > { %v2101_v20 = vpop.f32.mrb[50].mxu1 }
 0x6fd   : > { %2255 = vrot.lane.b32.xlu0 %v2101_v20, %s4235_s3  ;;  %v3559_v38 = vpop.f32.mrb[51].mxu1 }
 0x6fe   : > { %v4117_v38 = vld [vmem:[#allocation2 + $0x8] sm:$0xff] }
 0x700   : > { %v2106_v26 = vpop.f32.mrb[52].mxu1 }
 0x701   : > { %2257 = vrot.lane.b32.xlu0 %v2106_v26, %s4235_s3  ;;  %v3562_v30 = vpop.f32.mrb[53].mxu1 }
 0x704   : > { %v2111_v48 = vpop.f32.mrb[54].mxu1 }
 0x705   : > { %2259 = vrot.lane.b32.xlu0 %v2111_v48, %s4235_s3  ;;  %v3565_v63 = vpop.f32.mrb[55].mxu1 }
 0x709   : > { %v2016_v0 = vpop.f32.mrb[18].mxu0 }
 0x70a   : > { %v3546_v52 = vpop.f32.mrb[19].mxu0 }
 0x70b   : > { %v4118_v52 = vld [vmem:[#allocation2 + $0x10] sm:$0xff] }
 0x70d   : > { %v2116_v54 = vpop.f32.mrb[56].mxu1  ;;  %v2206_v19 = vpop.f32.mrb[20].mxu0 }
 0x70e   : > { %v3584_v55 = vpop.f32.mrb[21].mxu0  ;;  %2275 = vrot.lane.b32.xlu0 %v2206_v19, %s4236_s17  ;;  %2261 = vrot.lane.b32.xlu1 %v2116_v54, %s4235_s3  ;;  %v3568_v62 = vpop.f32.mrb[57].mxu1 }
 0x711   : > { %v2121_v32 = vpop.f32.mrb[58].mxu1  ;;  %v2211_v5 = vpop.f32.mrb[22].mxu0 }
 0x712   : > { %v3587_v22 = vpop.f32.mrb[23].mxu0  ;;  %2277 = vrot.lane.b32.xlu0 %v2211_v5, %s4236_s17  ;;  %v3571_v36 = vpop.f32.mrb[59].mxu1  ;;  %v4119_v5 = vld [vmem:[#allocation2 + $0x18] sm:$0xff] }
 0x715   : > { %v2216_v61 = vpop.f32.mrb[24].mxu0 }
 0x716   : > { %v3590_v8 = vpop.f32.mrb[25].mxu0  ;;  %2241 = vrot.lane.b32.xlu0 %v2011_v4, %s4234_s13  ;;  %2279 = vrot.lane.b32.xlu1 %v2216_v61, %s4236_s17 }
 0x719   : > { %v2221_v2 = vpop.f32.mrb[26].mxu0 }
 0x71a   : > { %v3593_v58 = vpop.f32.mrb[27].mxu0  ;;  %2281 = vrot.lane.b32.xlu0 %v2221_v2, %s4236_s17  ;;  %2243 = vrot.lane.b32.xlu1 %v2016_v0, %s4234_s13 }
 0x71d   : > { %v2226_v1 = vpop.f32.mrb[28].mxu0 }
 0x71e   : > { %v3596_v3 = vpop.f32.mrb[29].mxu0  ;;  %2283 = vrot.lane.b32.xlu1 %v2226_v1, %s4236_s17  ;;  %2263 = vrot.lane.b32.xlu0 %v2121_v32, %s4235_s3  ;;  %v4120_v1 = vld [vmem:[#allocation2 + $0x20] sm:$0xff] }
 0x74f   : > { %v2236_v12 = vpop.permute.xlu1 %2235 }
 0x750   : > { %v2290_v60 = vsel %vm1128_vm7, %v5029_v56, %v2236_v12  ;;  %v741_v12 = vld [vmem:[%s4419_s15] sm:$0xff] }
 0x753   : > { %v2238_v10 = vpop.permute.xlu0 %2237 }
 0x754   : > { %v2291_v13 = vsel %vm1128_vm7, %v5031_v17, %v2238_v10 }
 0x757   : > { %v2240_v9 = vpop.permute.xlu1 %2239 }
 0x758   : > { %v2292_v39 = vsel %vm1128_vm7, %v5033_v44, %v2240_v9  ;;  %v743_v9 = vld [vmem:[%s4419_s15 + $0x10] sm:$0xff] }
 0x76f   : > { %v2256_v7 = vpop.permute.xlu0 %2255 }
 0x770   : > { %v2296_v21 = vsel %vm2295_vm10, %v2290_v60, %v2256_v7 }
 0x773   : > { %v2258_v6 = vpop.permute.xlu0 %2257 }
 0x774   : > { %v2297_v14 = vsel %vm2295_vm10, %v2291_v13, %v2258_v6  ;;  %v746_v13 = vld [vmem:[%s4419_s15 + $0x28] sm:$0xff] }
 0x777   : > { %v2260_v31 = vpop.permute.xlu0 %2259 }
 0x778   : > { %v2298_v18 = vsel %vm2295_vm10, %v2292_v39, %v2260_v31  ;;  %v742_v31 = vld [vmem:[%s4419_s15 + $0x8] sm:$0xff]  ;;  %v749_v39 = vld [vmem:[%s4419_s15 + $0x40] sm:$0xff] }
 0x779   : > { %v3787_v60 = vpack.c.bf16 %v742_v31, %v741_v12 }
 0x77b   : > { %3789 = vmatpush3.bf16.xpose.msk.msra.mxu0 %vm4489_vm5, %v3787_v60 }
 0x77c   : > { %3790 = vmatprep.subr.bf16.mxu0 %v4220_v46 }
 0x780   : > { %v2276_v37 = vpop.permute.xlu0 %2275  ;;  %v2262_v42 = vpop.permute.xlu1 %2261 }
 0x781   : > { %v2302_v11 = vsel %vm2301_vm11, %v2296_v21, %v2276_v37  ;;  %v744_v21 = vld [vmem:[%s4419_s15 + $0x18] sm:$0xff] }
 0x782   : > { %3606 = vmatmul.mubr.msk.f32.vlgmr.msra.gmra.mrb[60].mxu1 %vm761_vm4, %v2302_v11  ;;  %v3791_v37 = vpack.c.bf16 %v744_v21, %v743_v9  ;;  %v745_v11 = vld [vmem:[%s4419_s15 + $0x20] sm:$0xff]  ;;  %v2505_v9 = vsub.s32 3, %v4552_v33 }
 0x783   : > { %3608 = vmatprep.mubr.msk.f32.mxu1 %vm4221_vm6, %v4222_v24 }
 0x784   : > { %v2278_v16 = vpop.permute.xlu0 %2277  ;;  %3793 = vmatpush3.bf16.xpose.msk.msra.mxu0 %vm4489_vm5, %v3791_v37  ;;  %v2514_v37 = vsub.s32 4, %v4552_v33 }
 0x785   : > { %v2303_v56 = vsel %vm2301_vm11, %v2297_v14, %v2278_v16  ;;  %3794 = vmatprep.subr.bf16.mxu0 %v4220_v46  ;;  %v3795_v14 = vpack.c.bf16 %v746_v13, %v745_v11  ;;  %v748_v16 = vld [vmem:[%s4419_s15 + $0x38] sm:$0xff]  ;;  %v2506_v13 = vrot.slane %v5096_v50, %v2505_v9 }
 0x786   : > { %3609 = vmatmul.mubr.msk.f32.gmra.mrb[62].mxu1 %vm761_vm4, %v2303_v56 }
 0x787   : > { %3611 = vmatprep.mubr.msk.f32.mxu1 %vm4221_vm6, %v4222_v24 }
 0x788   : > { %v2242_v17 = vpop.permute.xlu0 %2241  ;;  %v2280_v23 = vpop.permute.xlu1 %2279 }
 0x789   : > { %v2293_v43 = vsel %vm1128_vm7, %v5035_v25, %v2242_v17  ;;  %v2304_v59 = vsel %vm2301_vm11, %v2298_v18, %v2280_v23  ;;  %v750_v18 = vld [vmem:[%s4419_s15 + $0x48] sm:$0xff]  ;;  %v751_v23 = vld [vmem:[%s4419_s15 + $0x50] sm:$0xff] }
 0x78a   : > { %3612 = vmatmul.mubr.msk.f32.gmra.mrb[64].mxu1 %vm761_vm4, %v2304_v59  ;;  %v2299_v44 = vsel %vm2295_vm10, %v2293_v43, %v2262_v42  ;;  %v747_v42 = vld [vmem:[%s4419_s15 + $0x30] sm:$0xff]  ;;  %v3803_v17 = vpack.c.bf16 %v750_v18, %v749_v39  ;;  %v752_v43 = vld [vmem:[%s4419_s15 + $0x58] sm:$0xff] }
 0x78b   : > { %3614 = vmatprep.mubr.msk.f32.mxu1 %vm4221_vm6, %v4222_v24  ;;  %v3799_v56 = vpack.c.bf16 %v748_v16, %v747_v42  ;;  %v3807_v59 = vpack.c.bf16 %v752_v43, %v751_v23  ;;  %v2515_v16 = vrot.slane %v5096_v50, %v2514_v37 }
 0x78c   : > { %v2282_v41 = vpop.permute.xlu0 %2281  ;;  %v2244_v27 = vpop.permute.xlu1 %2243  ;;  %3797 = vmatpush3.bf16.xpose.msk.msra.mxu0 %vm4489_vm5, %v3795_v14 }
 0x78d   : > { %v2305_v35 = vsel %vm2301_vm11, %v2299_v44, %v2282_v41  ;;  %v2294_v25 = vsel %vm1128_vm7, %v5037_v51, %v2244_v27  ;;  %3798 = vmatprep.subr.bf16.mxu0 %v4220_v46 }
 0x78e   : > { %3615 = vmatmul.mubr.msk.f32.gmra.mrb[66].mxu1 %vm761_vm4, %v2305_v35 }
 0x78f   : > { %3617 = vmatprep.mubr.msk.f32.mxu1 %vm4221_vm6, %v4222_v24 }
 0x790   : > { %v2284_v47 = vpop.permute.xlu1 %2283  ;;  %v2264_v28 = vpop.permute.xlu0 %2263 }
 0x791   : > { %v2300_v40 = vsel %vm2295_vm10, %v2294_v25, %v2264_v28 }
 0x792   : > { %v2306_v4 = vsel %vm2301_vm11, %v2300_v40, %v2284_v47 }
 0x793   : > { %3618 = vmatmul.mubr.msk.f32.gmra.mrb[68].mxu1 %vm761_vm4, %v2306_v4 }
 0x794   : > { %3678 = vmatprep.mubr.msk.f32.mxu1 %vm4221_vm6, %v4222_v24  ;;  %3801 = vmatpush3.bf16.xpose.msk.msra.mxu0 %vm4489_vm5, %v3799_v56 }
 0x795   : > { %3802 = vmatprep.subr.bf16.mxu0 %v4220_v46 }
 0x79c   : > { %3805 = vmatpush3.bf16.xpose.msk.msra.mxu0 %vm4489_vm5, %v3803_v17 }
 0x79d   : > { %3806 = vmatprep.subr.bf16.mxu0 %v4220_v46 }
 0x7a4   : > { %3809 = vmatpush3.bf16.xpose.msk.msra.mxu0 %vm4489_vm5, %v3807_v59 }
 0x7a5   : > { %3810 = vmatprep.subr.bf16.mxu0 %v4220_v46 }
 0x855   : > { %v2400_v34 = vpop.f32.mrb[60].mxu1 }
 0x856   : > { %v2424_v51 = vadd.f32 %v4116_v15, %v2400_v34  ;;  %v3607_v53 = vpop.f32.mrb[61].mxu1 }
 0x858   : > { %v5099_v57 = vadd.f32 %v2432_v49, %v2424_v51 }
 0x859   : > { %v2405_v20 = vpop.f32.mrb[62].mxu1 }
 0x85a   : > { %v2425_v26 = vadd.f32 %v4117_v38, %v2405_v20  ;;  %v3610_v30 = vpop.f32.mrb[63].mxu1  ;;  %v2438_v48 = vsel %vm761_vm4, %v5099_v57, 0.0 }
 0x85b   : > { %2439 = vadd.xlane.f32.xlu0 %v2438_v48 }
 0x85c   : > { %v5103_v63 = vadd.f32 %v2432_v49, %v2425_v26 }
 0x85d   : > { %v2410_v0 = vpop.f32.mrb[64].mxu1 }
 0x85e   : > { %v2426_v54 = vadd.f32 %v4118_v52, %v2410_v0  ;;  %v3613_v19 = vpop.f32.mrb[65].mxu1  ;;  %v2441_v55 = vsel %vm761_vm4, %v5103_v63, 0.0 }
 0x85f   : > { %2442 = vadd.xlane.f32.xlu1 %v2441_v55 }
 0x860   : > { %v5107_v62 = vadd.f32 %v2432_v49, %v2426_v54 }
 0x861   : > { %v2415_v32 = vpop.f32.mrb[66].mxu1 }
 0x862   : > { %v2427_v22 = vadd.f32 %v4119_v5, %v2415_v32  ;;  %v3616_v36 = vpop.f32.mrb[67].mxu1  ;;  %v2444_v61 = vsel %vm761_vm4, %v5107_v62, 0.0  ;;  %v753_v32 = vld [vmem:[%s4419_s15 + $0x60] sm:$0xff]  ;;  %v754_v5 = vld [vmem:[%s4419_s15 + $0x68] sm:$0xff] }
 0x863   : > { %2445 = vadd.xlane.f32.xlu0 %v2444_v61  ;;  %v755_v36 = vld [vmem:[%s4419_s15 + $0x70] sm:$0xff]  ;;  %v756_v61 = vld [vmem:[%s4419_s15 + $0x78] sm:$0xff] }
 0x864   : > { %v5111_v8 = vadd.f32 %v2432_v49, %v2427_v22  ;;  %v3811_v22 = vpack.c.bf16 %v754_v5, %v753_v32 }
 0x866   : > { %v2420_v2 = vpop.f32.mrb[68].mxu1  ;;  %v2447_v58 = vsel %vm761_vm4, %v5111_v8, 0.0  ;;  %3813 = vmatpush3.bf16.xpose.msk.msra.mxu0 %vm4489_vm5, %v3811_v22 }
 0x867   : > { %v2428_v3 = vadd.f32 %v4120_v1, %v2420_v2  ;;  %2448 = vadd.xlane.f32.xlu0 %v2447_v58  ;;  %v3619_v10 = vpop.f32.mrb[69].mxu1  ;;  %3814 = vmatprep.subr.bf16.mxu0 %v4220_v46  ;;  %v3815_v2 = vpack.c.bf16 %v756_v61, %v755_v36 }
 0x869   : > { %v5115_v7 = vadd.f32 %v2432_v49, %v2428_v3 }
 0x86b   : > { %v2450_v6 = vsel %vm761_vm4, %v5115_v7, 0.0 }
 0x86c   : > { %2451 = vadd.xlane.f32.xlu1 %v2450_v6 }
 0x86e   : > { %3817 = vmatpush3.bf16.xpose.msk.msra.mxu0 %vm4489_vm5, %v3815_v2 }
 0x86f   : > { %3818 = vmatprep.subr.bf16.mxu0 %v4220_v46 }
 0x8e8   : > { %v2440_v41 = vpop.xlane.xlu0 %2439 }
 0x8e9   : > { %v2453_v44 = vmul.f32 0.03125, %v2440_v41 }
 0x8eb   : > { %v2458_v27 = vsub.f32 %v5099_v57, %v2453_v44 }
 0x8ec   : > { %v2443_v35 = vpop.xlane.xlu1 %2442 }
 0x8ed   : > { %v2454_v25 = vmul.f32 0.03125, %v2443_v35  ;;  %v2463_v47 = vmul.f32 %v2458_v27, %v2458_v27 }
 0x8ef   : > { %v2459_v28 = vsub.f32 %v5103_v63, %v2454_v25  ;;  %v2468_v40 = vsel %vm761_vm4, %v2463_v47, 0.0 }
 0x8f0   : > { %v2446_v4 = vpop.xlane.xlu0 %2445  ;;  %2469 = vadd.xlane.f32.xlu0 %v2468_v40 }
 0x8f1   : > { %v2455_v29 = vmul.f32 0.03125, %v2446_v4  ;;  %v2464_v49 = vmul.f32 %v2459_v28, %v2459_v28 }
 0x8f3   : > { %v5153_v34 = vsub.f32 %v5107_v62, %v2455_v29  ;;  %v2471_v15 = vsel %vm761_vm4, %v2464_v49, 0.0 }
 0x8f4   : > { %v2449_v51 = vpop.xlane.xlu0 %2448  ;;  %2472 = vadd.xlane.f32.xlu1 %v2471_v15 }
 0x8f5   : > { %v2456_v53 = vmul.f32 0.03125, %v2449_v51  ;;  %v2465_v20 = vmul.f32 %v5153_v34, %v5153_v34 }
 0x8f7   : > { %v5159_v38 = vsub.f32 %v5111_v8, %v2456_v53  ;;  %v2474_v26 = vsel %vm761_vm4, %v2465_v20, 0.0  ;;  %v757_v20 = vld [vmem:[%s4424_s20] sm:$0xff] }
 0x8f8   : > { %2475 = vadd.xlane.f32.xlu0 %v2474_v26 }
 0x8f9   : > { %v2452_v30 = vpop.xlane.xlu1 %2451  ;;  %v2466_v48 = vmul.f32 %v5159_v38, %v5159_v38 }
 0x8fa   : > { %v2457_v0 = vmul.f32 0.03125, %v2452_v30  ;;  %v759_v30 = vld [vmem:[%s4424_s20 + $0x10] sm:$0xff] }
 0x8fb   : > { %v2477_v52 = vsel %vm761_vm4, %v2466_v48, 0.0  ;;  %v760_v48 = vld [vmem:[%s4424_s20 + $0x18] sm:$0xff] }
 0x8fc   : > { %v2462_v54 = vsub.f32 %v5115_v7, %v2457_v0  ;;  %2478 = vadd.xlane.f32.xlu1 %v2477_v52  ;;  %v3822_v0 = vpack.c.bf16 %v760_v48, %v759_v30  ;;  %v3161_v52 = vld [vmem:[%s564_s19] ss:$0 sm:$0xff] }
 0x8fe   : > { %v2467_v19 = vmul.f32 %v2462_v54, %v2462_v54 }
 0x900   : > { %v2480_v55 = vsel %vm761_vm4, %v2467_v19, 0.0 }
 0x901   : > { %2481 = vadd.xlane.f32.xlu0 %v2480_v55 }
 0x97d   : > { %v2470_v58 = vpop.xlane.xlu0 %2469 }
 0x97e   : > { %v2483_v1 = vmul.f32 0.03125, %v2470_v58 }
 0x980   : > { %v2488_v3 = vadd.f32 1e-05, %v2483_v1 }
 0x981   : > { %v2473_v10 = vpop.xlane.xlu1 %2472 }
 0x982   : > { %4095 = vrsqrt.f32 %v2488_v3  ;;  %v2484_v6 = vmul.f32 0.03125, %v2473_v10 }
 0x984   : > { %v2489_v12 = vadd.f32 1e-05, %v2484_v6 }
 0x985   : > { %v2476_v31 = vpop.xlane.xlu0 %2475 }
 0x986   : > { %4097 = vrsqrt.f32 %v2489_v12  ;;  %v2485_v60 = vmul.f32 0.03125, %v2476_v31 }
 0x988   : > { %v2490_v21 = vadd.f32 1e-05, %v2485_v60 }
 0x989   : > { %v2479_v11 = vpop.xlane.xlu1 %2478 }
 0x98a   : > { %4099 = vrsqrt.f32 %v2490_v21  ;;  %v2486_v45 = vmul.f32 0.03125, %v2479_v11 }
 0x98c   : > { %v4096_v14 = vpop.eup %4095  ;;  %v2491_v42 = vadd.f32 1e-05, %v2486_v45 }
 0x98d   : > { %v2498_v56 = vmul.f32 %v4096_v14, %v2458_v27 }
 0x98e   : > { %4101 = vrsqrt.f32 %v2491_v42  ;;  %v2482_v39 = vpop.xlane.xlu0 %2481 }
 0x98f   : > { %v2507_v18 = vmul.f32 %v2506_v13, %v2498_v56  ;;  %v2487_v17 = vmul.f32 0.03125, %v2482_v39 }
 0x990   : > { %v4098_v23 = vpop.eup %4097 }
 0x991   : > { %v2516_v43 = vadd.f32 %v2515_v16, %v2507_v18  ;;  %v2492_v59 = vadd.f32 1e-05, %v2487_v17  ;;  %v2499_v41 = vmul.f32 %v4098_v23, %v2459_v28 }
 0x993   : > { %4103 = vrsqrt.f32 %v2492_v59  ;;  %3653 = vmatmul.mubr.msk.f32.vlgmr.msra.gmra.mrb[30].mxu0 %vm761_vm4, %v2516_v43  ;;  %v2508_v44 = vmul.f32 %v2506_v13, %v2499_v41 }
 0x994   : > { %v4100_v35 = vpop.eup %4099  ;;  %3655 = vmatprep.mubr.msk.f32.mxu0 %vm4221_vm6, %v4222_v24 }
 0x995   : > { %v2517_v25 = vadd.f32 %v2515_v16, %v2508_v44  ;;  %v2500_v47 = vmul.f32 %v4100_v35, %v5153_v34 }
 0x997   : > { %3656 = vmatmul.mubr.msk.f32.gmra.mrb[32].mxu0 %vm761_vm4, %v2517_v25  ;;  %v2509_v27 = vmul.f32 %v2506_v13, %v2500_v47 }
 0x998   : > { %v4102_v40 = vpop.eup %4101  ;;  %3658 = vmatprep.mubr.msk.f32.mxu0 %vm4221_vm6, %v4222_v24 }
 0x999   : > { %v2518_v28 = vadd.f32 %v2515_v16, %v2509_v27  ;;  %v2501_v4 = vmul.f32 %v4102_v40, %v5159_v38  ;;  %v758_v38 = vld [vmem:[%s4424_s20 + $0x8] sm:$0xff] }
 0x99a   : > { %v3819_v26 = vpack.c.bf16 %v758_v38, %v757_v20 }
 0x99b   : > { %3659 = vmatmul.mubr.msk.f32.gmra.mrb[34].mxu0 %vm761_vm4, %v2518_v28  ;;  %v2510_v29 = vmul.f32 %v2506_v13, %v2501_v4 }
 0x99c   : > { %3661 = vmatprep.mubr.msk.f32.mxu0 %vm4221_vm6, %v4222_v24  ;;  %3820 = vmatpush3.bf16.xpose.msra.mxu0 %v3819_v26 }
 0x99d   : > { %v4104_v49 = vpop.eup %4103  ;;  %v2519_v34 = vadd.f32 %v2515_v16, %v2510_v29  ;;  %3830 = vmatpush3.bf16.xpose.msra.mxu1 %v3819_v26  ;;  %3821 = vmatprep.subr.bf16.mxu0 %v4220_v46 }
 0x99e   : > { %v2502_v15 = vmul.f32 %v4104_v49, %v2462_v54  ;;  %3829 = vmatprep.subr.bf16.mxu1 %v4220_v46 }
 0x99f   : > { %3662 = vmatmul.mubr.msk.f32.gmra.mrb[36].mxu0 %vm761_vm4, %v2519_v34 }
 0x9a0   : > { %3664 = vmatprep.mubr.msk.f32.mxu0 %vm4221_vm6, %v4222_v24  ;;  %v2511_v51 = vmul.f32 %v2506_v13, %v2502_v15 }
 0x9a2   : > { %v2520_v53 = vadd.f32 %v2515_v16, %v2511_v51 }
 0x9a4   : > { %3665 = vmatmul.mubr.msk.f32.gmra.mrb[38].mxu0 %vm761_vm4, %v2520_v53 }
 0x9a5   : > { %3675 = vmatprep.mubr.msk.f32.mxu0 %vm4221_vm6, %v4222_v24  ;;  %3823 = vmatpush3.bf16.xpose.msra.mxu0 %v3822_v0 }
 0x9a6   : > { %3831 = vmatpush3.bf16.xpose.msra.mxu1 %v3822_v0 }
 0xa66   : > { %v2656_v54 = vpop.f32.mrb[30].mxu0 }
 0xa67   : > { %v2657_v19 = vadd.f32 %v3161_v52, %v2656_v54  ;;  %v3654_v55 = vpop.f32.mrb[31].mxu0 }
 0xa69   : > { %v2685_v32 = vmul.f32 0.044715, %v2657_v19  ;;  %v2680_v47 = vmul.f32 0.5, %v2657_v19 }
 0xa6a   : > { %v2661_v5 = vpop.f32.mrb[32].mxu0 }
 0xa6b   : > { %v2690_v22 = vmul.f32 %v2685_v32, %v2657_v19  ;;  %v2662_v36 = vadd.f32 %v3161_v52, %v2661_v5  ;;  %v3657_v61 = vpop.f32.mrb[33].mxu0  ;;  %v2822_v5 = vsub.s32 5, %v4552_v33 }
 0xa6d   : > { %v2695_v2 = vmul.f32 %v2690_v22, %v2657_v19  ;;  %v2686_v46 = vmul.f32 0.044715, %v2662_v36  ;;  %v2681_v49 = vmul.f32 0.5, %v2662_v36  ;;  %v2823_v22 = vrot.slane %v5096_v50, %v2822_v5 }
 0xa6e   : > { %v2666_v58 = vpop.f32.mrb[34].mxu0 }
 0xa6f   : > { %v2700_v1 = vadd.f32 %v2695_v2, %v2657_v19  ;;  %v2691_v3 = vmul.f32 %v2686_v46, %v2662_v36  ;;  %v2667_v10 = vadd.f32 %v3161_v52, %v2666_v58  ;;  %v3660_v6 = vpop.f32.mrb[35].mxu0 }
 0xa71   : > { %v2705_v12 = vmul.f32 0.7978846, %v2700_v1  ;;  %v2696_v31 = vmul.f32 %v2691_v3, %v2662_v36  ;;  %v2687_v60 = vmul.f32 0.044715, %v2667_v10  ;;  %v2682_v20 = vmul.f32 0.5, %v2667_v10 }
 0xa72   : > { %v2671_v9 = vpop.f32.mrb[36].mxu0 }
 0xa73   : > { %4105 = vtanh.f32 %v2705_v12  ;;  %v2701_v21 = vadd.f32 %v2696_v31, %v2662_v36  ;;  %v2692_v37 = vmul.f32 %v2687_v60, %v2667_v10  ;;  %v2672_v11 = vadd.f32 %v3161_v52, %v2671_v9  ;;  %v3663_v45 = vpop.f32.mrb[37].mxu0 }
 0xa75   : > { %v2706_v13 = vmul.f32 0.7978846, %v2701_v21  ;;  %v2688_v14 = vmul.f32 0.044715, %v2672_v11  ;;  %v2697_v42 = vmul.f32 %v2692_v37, %v2667_v10  ;;  %v2683_v48 = vmul.f32 0.5, %v2672_v11 }
 0xa77   : > { %4107 = vtanh.f32 %v2706_v13  ;;  %v2693_v16 = vmul.f32 %v2688_v14, %v2672_v11  ;;  %v2676_v56 = vpop.f32.mrb[38].mxu0  ;;  %v2702_v39 = vadd.f32 %v2697_v42, %v2667_v10  ;;  %v2841_v14 = vld [vmem:[%s5331_s10 + $0x18] sm:$0xff] (!%p3183_p1) }
 0xa78   : > { %v2677_v18 = vadd.f32 %v3161_v52, %v2676_v56  ;;  %v3666_v17 = vpop.f32.mrb[39].mxu0 }
 0xa79   : > { %v2707_v23 = vmul.f32 0.7978846, %v2702_v39  ;;  %v2698_v43 = vmul.f32 %v2693_v16, %v2672_v11  ;;  %v2842_v16 = vld [vmem:[%s5331_s10 + $0x20] sm:$0xff] (!%p3183_p1) }
 0xa7a   : > { %v2689_v59 = vmul.f32 0.044715, %v2677_v18  ;;  %v2684_v19 = vmul.f32 0.5, %v2677_v18 }
 0xa7b   : > { %4109 = vtanh.f32 %v2707_v23  ;;  %v2703_v41 = vadd.f32 %v2698_v43, %v2672_v11  ;;  %v2839_v11 = vld [vmem:[%s5331_s10 + $0x8] sm:$0xff] (!%p3183_p1) }
 0xa7c   : > { %v2694_v44 = vmul.f32 %v2689_v59, %v2677_v18  ;;  %v2863_v59 = vld [vmem:[%s5376_s27] sm:$0xff] (!%p3183_p1) }
 0xa7d   : > { %v4106_v35 = vpop.eup %4105  ;;  %v2708_v25 = vmul.f32 0.7978846, %v2703_v41 }
 0xa7e   : > { %v2715_v27 = vadd.f32 1.0, %v4106_v35  ;;  %v2699_v40 = vmul.f32 %v2694_v44, %v2677_v18  ;;  %v2865_v35 = vld [vmem:[%s5377_s0 + $0x10] sm:$0xff] (!%p3183_p1) }
 0xa7f   : > { %4111 = vtanh.f32 %v2708_v25  ;;  %v2864_v25 = vld [vmem:[%s5377_s0 + $0x8] sm:$0xff] (!%p3183_p1) }
 0xa80   : > { %v2720_v28 = vmul.f32 %v2715_v27, %v2680_v47  ;;  %v2704_v4 = vadd.f32 %v2699_v40, %v2677_v18  ;;  %v2866_v47 = vld [vmem:[%s5377_s0 + $0x18] sm:$0xff] (!%p3183_p1) }
 0xa81   : > { %v4108_v29 = vpop.eup %4107 }
 0xa82   : > { %3676 = vmatmul.mubr.f32.vlgmr.msra.gmra.mrb[40].mxu0 %v2720_v28  ;;  %v2716_v34 = vadd.f32 1.0, %v4108_v29  ;;  %v2709_v15 = vmul.f32 0.7978846, %v2704_v4 }
 0xa84   : > { %v2721_v51 = vmul.f32 %v2716_v34, %v2681_v49  ;;  %4113 = vtanh.f32 %v2709_v15  ;;  %v2867_v34 = vld [vmem:[%s5377_s0 + $0x20] sm:$0xff] (!%p3183_p1) }
 0xa85   : > { %v4110_v53 = vpop.eup %4109 }
 0xa86   : > { %3679 = vmatmul.mubr.f32.vlgmr.msra.gmra.mrb[70].mxu1 %v2721_v51  ;;  %v2717_v38 = vadd.f32 1.0, %v4110_v53 }
 0xa87   : > { %3681 = vmatprep.mubr.msk.f32.mxu1 %vm4221_vm6, %v4222_v24 }
 0xa88   : > { %v2722_v26 = vmul.f32 %v2717_v38, %v2682_v20 }
 0xa89   : > { %v4112_v30 = vpop.eup %4111 }
 0xa8a   : > { %3682 = vmatmul.mubr.f32.gmra.mrb[72].mxu1 %v2722_v26  ;;  %v2718_v0 = vadd.f32 1.0, %v4112_v30 }
 0xa8b   : > { %3684 = vmatprep.mubr.msk.f32.mxu1 %vm4221_vm6, %v4222_v24 }
 0xa8c   : > { %v2723_v52 = vmul.f32 %v2718_v0, %v2683_v48 }
 0xa8e   : > { %v4114_v54 = vpop.eup %4113  ;;  %3685 = vmatmul.mubr.f32.gmra.mrb[74].mxu1 %v2723_v52 }
 0xa8f   : > { %3687 = vmatprep.mubr.msk.f32.mxu1 %vm4221_vm6, %v4222_v24  ;;  %v2719_v55 = vadd.f32 1.0, %v4114_v54 }
 0xa91   : > { %v2724_v32 = vmul.f32 %v2719_v55, %v2684_v19 }
 0xa93   : > { %3688 = vmatmul.mubr.f32.gmra.mrb[76].mxu1 %v2724_v32 }
 0xb55   : > { %v2791_v36 = vpop.f32.mrb[40].mxu0 }
 0xb56   : > { %v2815_v61 = vadd.f32 %v2791_v36, %v5099_v57  ;;  %v3677_v2 = vpop.f32.mrb[41].mxu0  ;;  %v2889_v36 = vld [vmem:[%s5378_s21] sm:$0x1] (!%p3183_p1) }
 0xb58   : > { %v2824_v46 = vadd.f32 %v2823_v22, %v2815_v61 }
 0xb59   : > { %v2796_v58 = vpop.f32.mrb[70].mxu1 }
 0xb5a   : > { %2829 = vst.msk [vmem:[#allocation2] sm:$0xff] %vm761_vm4, %v2824_v46  ;;  %v2816_v1 = vadd.f32 %v2796_v58, %v5103_v63  ;;  %v3680_v3 = vpop.f32.mrb[71].mxu1 }
 0xb5c   : > { %v2825_v24 = vadd.f32 %v2823_v22, %v2816_v1 }
 0xb5d   : > { %v2801_v10 = vpop.f32.mrb[72].mxu1 }
 0xb5e   : > { %2830 = vst.msk [vmem:[#allocation2 + $0x8] sm:$0xff] %vm761_vm4, %v2825_v24  ;;  %v2817_v6 = vadd.f32 %v2801_v10, %v5107_v62  ;;  %v3683_v33 = vpop.f32.mrb[73].mxu1  ;;  %v2838_v62 = vld [vmem:[%s5331_s10] sm:$0xff] (!%p3183_p1)  ;;  %v2844_v13 = vmul.f32 (!%p3183_p1), %v2839_v11, %v2825_v24 }
 0xb60   : > { %v2826_v12 = vadd.f32 %v2823_v22, %v2817_v6  ;;  %v2851_v18 = vsel (!%p3183_p1), %vm761_vm4, %v2844_v13, 0.0 }
 0xb61   : > { %v2806_v50 = vpop.f32.mrb[74].mxu1 }
 0xb62   : > { %2831 = vst.msk [vmem:[#allocation2 + $0x10] sm:$0xff] %vm761_vm4, %v2826_v12  ;;  %v2818_v57 = vadd.f32 %v2806_v50, %v5111_v8  ;;  %v3686_v31 = vpop.f32.mrb[75].mxu1  ;;  %v2840_v8 = vld [vmem:[%s5331_s10 + $0x10] sm:$0xff] (!%p3183_p1) }
 0xb63   : > { %v2845_v45 = vmul.f32 (!%p3183_p1), %v2840_v8, %v2826_v12 }
 0xb64   : > { %v2827_v60 = vadd.f32 %v2823_v22, %v2818_v57 }
 0xb65   : > { %2837 = sbr.rel (%p3183_p1) target bundleno = 3094 (0xc16), region = 80  ;;  %v2854_v39 = vsel (!%p3183_p1), %vm761_vm4, %v2845_v45, 0.0 }
 0xb66   : > { %2832 = vst.msk [vmem:[#allocation2 + $0x18] sm:$0xff] %vm761_vm4, %v2827_v60  ;;  %v2811_v9 = vpop.f32.mrb[76].mxu1  ;;  %v2846_v42 = vmul.f32 (!%p3183_p1), %v2841_v14, %v2827_v60  ;;  %2855 = vadd.xlane.f32.xlu1 (!%p3183_p1), %v2854_v39 }
 0xb67   : > { %v2819_v63 = vadd.f32 %v2811_v9, %v5115_v7  ;;  %v3689_v21 = vpop.f32.mrb[77].mxu1  ;;  %v2843_v7 = vmul.f32 (!%p3183_p1), %v2838_v62, %v2824_v46 }
 0xb68   : > { %v2857_v17 = vsel (!%p3183_p1), %vm761_vm4, %v2846_v42, 0.0 }
 0xb69   : > { %v2828_v37 = vadd.f32 %v2823_v22, %v2819_v63  ;;  %v2848_v56 = vsel (!%p3183_p1), %vm761_vm4, %v2843_v7, 0.0 }
 0xb6a   : > { %2849 = vadd.xlane.f32.xlu0 (!%p3183_p1), %v2848_v56  ;;  %2858 = vadd.xlane.f32.xlu1 (!%p3183_p1), %v2857_v17 }
 0xb6b   : > { %2833 = vst.msk [vmem:[#allocation2 + $0x20] sm:$0xff] %vm761_vm4, %v2828_v37  ;;  %v2847_v23 = vmul.f32 (!%p3183_p1), %v2842_v16, %v2828_v37 }
 0xb6d   : > { %v2860_v43 = vsel %vm761_vm4, %v2847_v23, 0.0 }
 0xb6e   : > { %2852 = vadd.xlane.f32.xlu0 %v2851_v18 }
 0xb72   : > { %2861 = vadd.xlane.f32.xlu0 %v2860_v43 }
 0xbf3   : > { %v2856_v44 = vpop.xlane.xlu1 %2855 }
 0xbf4   : > { %v2870_v4 = vmul.f32 %v2865_v35, %v2856_v44 }
 0xbf6   : > { %v2877_v38 = vsel %vm2873_vm12, %v2870_v4, 0.0 }
 0xbf7   : > { %v2850_v41 = vpop.xlane.xlu0 %2849  ;;  %v2859_v28 = vpop.xlane.xlu1 %2858 }
 0xbf8   : > { %v2868_v27 = vmul.f32 %v2863_v59, %v2850_v41  ;;  %v2871_v49 = vmul.f32 %v2866_v47, %v2859_v28 }
 0xbfa   : > { %v2874_v15 = vsel %vm2873_vm12, %v2868_v27, 0.0  ;;  %v2879_v26 = vsel %vm2873_vm12, %v2871_v49, 0.0 }
 0xbfb   : > { %v2853_v40 = vpop.xlane.xlu0 %2852 }
 0xbfc   : > { %v2869_v29 = vmul.f32 %v2864_v25, %v2853_v40 }
 0xbfe   : > { %v2875_v51 = vsel %vm2873_vm12, %v2869_v29, 0.0 }
 0xbff   : > { %v2876_v53 = vadd.f32 %v2875_v51, %v2874_v15  ;;  %v2862_v20 = vpop.xlane.xlu0 %2861 }
 0xc00   : > { %v2872_v30 = vmul.f32 %v2867_v34, %v2862_v20 }
 0xc01   : > { %v2878_v48 = vadd.f32 %v2877_v38, %v2876_v53 }
 0xc02   : > { %v2881_v0 = vsel %vm2873_vm12, %v2872_v30, 0.0 }
 0xc03   : > { %v2880_v52 = vadd.f32 %v2879_v26, %v2878_v48 }
 0xc05   : > { %v2882_v54 = vadd.f32 %v2881_v0, %v2880_v52 }
 0xc07   : > { %v2883_v19 = vrot.slane %v2882_v54, 4 }
 0xc09   : > { %v2884_v55 = vadd.f32 %v2883_v19, %v2882_v54 }
 0xc0b   : > { %v2885_v32 = vrot.slane %v2884_v55, 2 }
 0xc0d   : > { %v2886_v5 = vadd.f32 %v2885_v32, %v2884_v55 }
 0xc0f   : > { %v2887_v22 = vrot.slane %v2886_v5, 1 }
 0xc11   : > { %v2888_v61 = vadd.f32 %v2887_v22, %v2886_v5 }
 0xc13   : > { %v2890_v2 = vadd.f32 %v2889_v36, %v2888_v61 }
 0xc15   : > { %2892 = vst.msk [vmem:[%s4428_s5] sm:$0x1] %vm2891_vm13, %v2890_v2 }
 0xc16 PF: > { %s5379_s24 = sld [smem:[#allocation8_spill]]  ;;  %s2906_s27 = sshll.u32 %s4428_s5, 4  ;;  %s2907_s27 = int_to_ptr.vmem [resolvable:$true] %s2906_s27 }
 0xc17   : > { %s5381_s29 = sld [smem:[#allocation22_spill]]  ;;  %s5383_s30 = sand.u32 1, %s4191_s26  }
 0xc18   : > { %s2894_s14 = scalar_lea.sflag [#allocation4], %s5383_s30  ;;  %s4121_s13 = scalar_lea.vmem %s2907_s27, 16 }
 0xc19   : > { %p4122_p2 = scmp.ne.s32.totalorder %s2907_s27, %s4121_s13  ;;  %s4237_s3 = smov [#allocation3]  }
 0xc1a   : > { %s4125_s17 = sshll.u32 %s4237_s3, 4  ;;  %s4126_s17 = int_to_ptr.vmem [resolvable:$false] %s4125_s17 }
 0xc1b   : > { %p4123_p4 = pnand %p4122_p2, %p4357_p3  ;;  %s4127_s16 = scalar_lea.vmem %s4126_s17, 32 }
 0xc1c   : > { %s3184_s25 = sshll.u32 %s5379_s24, 4  ;;  %p4128_p6 = scmp.lt.s32.totalorder %s2907_s27, %s4126_s17 }
 0xc1d   : > { %s5382_s11 = smov %s5381_s29  ;;  %s5271_s12 = scalar_lea.hbm %s5381_s29, %s3184_s25 }
 0xc1e   : > { %p4124_p5 = pneg %p4123_p4  ;;  %p4129_p7 = scmp.lt.s32.totalorder %s4127_s16, %s4121_s13 }
 0xc20   : > { %p4130_p8 = por %p4129_p7, %p4128_p6 }
 0xc22   : > { %p4131_p10 = pnand %p4130_p8, %p4124_p5 }
 0xc24   : > { %4134 = shalt.err (!%p4131_p10)
}
 0xc25   : > { %s4135_s5 = scalar_lea.hbm %s5271_s12, 16  ;;  %s4139_s19 = scalar_lea.hbm %s5382_s11, 32 }
 0xc26   : > { %p4136_p11 = scmp.ne.s32.totalorder %s5271_s12, %s4135_s5  ;;  %p4140_p0 = scmp.lt.u32.totalorder %s5271_s12, %s5382_s11 }
 0xc27   : > { %p4141_p1 = scmp.lt.u32.totalorder %s4139_s19, %s4135_s5  ;;  %p4143_p4 = scmp.lt.u32.totalorder %s4135_s5, %s5271_s12 }
 0xc28   : > { %p4137_p12 = pnand %p4136_p11, %p4357_p3 }
 0xc29   : > { %p4142_p2 = por %p4141_p1, %p4140_p0 }
 0xc2a   : > { %p4138_p13 = pneg %p4137_p12 }
 0xc2b   : > { %p4144_p5 = por %p4143_p4, %p4142_p2 }
 0xc2d   : > { %p4145_p6 = pnand %p4144_p5, %p4138_p13 }
 0xc2f   : > { %4148 = shalt.err (!%p4145_p6)
}
 0xc30   : > { %3834 = dma.vmem_to_hbm [thread:$0]  (%p4357_p3), %s2907_s27, 16, %s5271_s12, %s2894_s14  }
 0xc31 PF: > { %s5384_s24 = sld [smem:[#allocation11_spill]]  ;;  %s5385_s25 = sld [smem:[#allocation6_spill]] }
 0xc37   : > { %p3840_p7 = scmp.ge.s32.totalorder %s5384_s24, 2  ;;  %s2918_s28 = sand.u32 1, %s5385_s25  }
 0xc38   : > { %s2919_s29 = scalar_lea.sflag [#allocation4], %s2918_s28 }
 0xc39   : > { %p3837_p8 = pnand %p3840_p7, %p4367_p9 }
 0xc3b   : > { %4182 = dma.done.wait (!%p3837_p8), %s2919_s29, 16  }
 0xc3c   : > { %4184 = vsyncadd (!%p3837_p8), %s2919_s29, 4294967280  ;;  %s26_s15 = sadd.s32 1, %s5384_s24   ;;  %s5387_s30 = sld [smem:[#allocation7_spill]] }
 0xc3d   : > { %p23_p10 = scmp.ge.s32.totalorder %s26_s15, 6   ;;  %s5388_s27 = sld [smem:[#allocation16_spill]] }
 0xc3e   : > { %s5389_s28 = sld [smem:[#allocation9_spill]]  ;;  %s5390_s29 = sld [smem:[#allocation10_spill]] }
 0xc3f   : > { %s5391_s22 = sld [smem:[#allocation12_spill]]  ;;  %s5392_s14 = sld [smem:[#allocation14_spill]] }
 0xc40   : > { %s5393_s25 = smov %s4191_s26  ;;  %25 = sbr.rel (!%p23_p10) target bundleno = 12 (0xc), region = 136 }
 0xc42   : > { %s5394_s26 = smov %s5387_s30 }
 0xc45   : > { %s5395_s30 = smov %s5391_s22 }
 0xc47   :  { %2923 = vsyncpa [#allocation4], 1 }
 0xc48   :  { %2925 = vsyncpa [#allocation4 + $0x1], 1 }

</bundles_post_ra>
